<compile_context>
chip_gen: v5e
topology: v5e:2x2
jax: 0.10.0
libtpu: 0.0.40
codegen_flags: <defaults>
</compile_context>

<pallas_src>
import functools
import math

import jax
import jax.numpy as jnp
from jax import lax
from jax.experimental import pallas as pl
from jax.experimental.pallas import tpu as pltpu

LMK_DIM = 68 * 2          # 136
LMK_DIM_PAD = 256         # first-matmul K padded to MXU depth with zeros
FEAT1 = 256
FEAT2 = 512
HIDDEN = 256
NUM_LSTM_LAYERS = 3


def _sigmoid(z):
    # Explicit exp form lowers cleanly on Mosaic (EUP).
    return 1.0 / (1.0 + jnp.exp(-z))


def _round_up(x, m):
    return (x + m - 1) // m * m


def _vmem_limit_bytes(total_operand_bytes):
    # Generous but bounded: 2x (double-buffering) + slack, clamped to
    # [16 MiB, 64 MiB] so it is valid on v5e/v6e (128 MiB) and v7x (64 MiB).
    return int(min(64 * 2**20, max(16 * 2**20, 2 * int(total_operand_bytes) + 4 * 2**20)))


# --------------------------------------------------------------------------
# Kernel A: fused feature MLP + layer-1 LSTM input projection
#   gx1 = relu(relu(x@W1+b1)@W2+b2) @ W_ih1 + (b_ih1 + b_hh1)
# --------------------------------------------------------------------------
def _mlp_proj_kernel(x_ref, w1_ref, b1_ref, w2_ref, b2_ref, wih_ref, bl_ref, o_ref):
    x = x_ref[...]                                                     # (tm, 256) f32
    h = jnp.dot(x.astype(w1_ref.dtype), w1_ref[...],
                preferred_element_type=jnp.float32) + b1_ref[...]
    h = jnp.maximum(h, 0.0)
    f = jnp.dot(h.astype(w2_ref.dtype), w2_ref[...],
                preferred_element_type=jnp.float32) + b2_ref[...]
    f = jnp.maximum(f, 0.0)
    g = jnp.dot(f.astype(wih_ref.dtype), wih_ref[...],
                preferred_element_type=jnp.float32) + bl_ref[...]
    o_ref[...] = g.astype(o_ref.dtype)                                 # (tm, 1024)


def mlp_and_layer1_projection(x_rows, w1, b1, w2, b2, wih1, bl1, *, tile_m=512):
    m, k = x_rows.shape
    n_out = wih1.shape[1]

    # Tile as big as useful, but keep >=2 grid blocks when rows allow so v7x
    # megacore can shard this "parallel" axis across both TensorCores.
    tm = min(tile_m, _round_up(m, 8))
    if m > 8 and _round_up(m, 8) // tm < 2:
        tm = _round_up(pl.cdiv(m, 2), 8)

    pad = (-m) % tm
    if pad:
        x_rows = jnp.concatenate([x_rows, jnp.zeros((pad, k), x_rows.dtype)], axis=0)
    mp = m + pad

    total_bytes = (x_rows.size * x_rows.dtype.itemsize + w1.nbytes + b1.nbytes
                   + w2.nbytes + b2.nbytes + wih1.nbytes + bl1.nbytes + mp * n_out * 4)

    out = pl.pallas_call(
        _mlp_proj_kernel,
        out_shape=jax.ShapeDtypeStruct((mp, n_out), jnp.float32),
        grid=(mp // tm,),
        in_specs=[
            pl.BlockSpec((tm, k), lambda i: (i, 0)),
            pl.BlockSpec((k, FEAT1), lambda i: (0, 0)),        # resident weights
            pl.BlockSpec((1, FEAT1), lambda i: (0, 0)),
            pl.BlockSpec((FEAT1, FEAT2), lambda i: (0, 0)),    # resident
            pl.BlockSpec((1, FEAT2), lambda i: (0, 0)),
            pl.BlockSpec((FEAT2, n_out), lambda i: (0, 0)),    # resident
            pl.BlockSpec((1, n_out), lambda i: (0, 0)),
        ],
        out_specs=pl.BlockSpec((tm, n_out), lambda i: (i, 0)),
        compiler_params=pltpu.CompilerParams(
            dimension_semantics=("parallel",),
            vmem_limit_bytes=_vmem_limit_bytes(total_bytes),
        ),
    )(x_rows, w1, b1, w2, b2, wih1, bl1)
    return out[:m]


# --------------------------------------------------------------------------
# Kernel B: fused 3-layer LSTM recurrence + decision Linear + masked mean pool
#   Single pallas_call, time loop inside the kernel, h/c as loop carries.
#   Layer 1 input gates are precomputed (gx1); layers 2/3 use a single
#   concatenated [W_ih; W_hh] matmul per step.
# --------------------------------------------------------------------------
def _lstm_stack_decision_kernel(gx1_ref, whh1_ref, w2_ref, b2_ref, w3_ref, b3_ref,
                                wdec_ref, bdec_ref, len_ref, o_ref,
                                *, hidden, seq_len, batch, unroll):
    H = hidden
    whh1 = whh1_ref[...]            # (H, 4H)   bf16, resident
    w2 = w2_ref[...]                # (2H, 4H)  bf16, resident
    b2 = b2_ref[...]                # (1, 4H)   f32
    w3 = w3_ref[...]                # (2H, 4H)  bf16, resident
    b3 = b3_ref[...]                # (1, 4H)   f32
    wdec = wdec_ref[...]            # (1, H)    f32
    lens = len_ref[...]             # (B, 1)    int32

    def cell(gates, c_prev):
        # PyTorch gate order i, f, g, o
        i_g = _sigmoid(gates[:, 0 * H:1 * H])
        f_g = _sigmoid(gates[:, 1 * H:2 * H])
        g_g = jnp.tanh(gates[:, 2 * H:3 * H])
        o_g = _sigmoid(gates[:, 3 * H:4 * H])
        c_new = f_g * c_prev + i_g * g_g
        h_new = o_g * jnp.tanh(c_new)
        return h_new, c_new

    def step(t, carry):
        h1, c1, h2, c2, h3, c3, acc = carry
        # layer 1: input projection fully hoisted into Kernel A
        gates1 = gx1_ref[t] + jnp.dot(h1.astype(whh1.dtype), whh1,
                                      preferred_element_type=jnp.float32)
        h1, c1 = cell(gates1, c1)
        # layer 2: [h1_new | h2_prev] @ [W_ih2; W_hh2]  (one matmul, K = 512)
        in2 = jnp.concatenate([h1, h2], axis=-1).astype(w2.dtype)
        gates2 = jnp.dot(in2, w2, preferred_element_type=jnp.float32) + b2
        h2, c2 = cell(gates2, c2)
        # layer 3
        in3 = jnp.concatenate([h2, h3], axis=-1).astype(w3.dtype)
        gates3 = jnp.dot(in3, w3, preferred_element_type=jnp.float32) + b3
        h3, c3 = cell(gates3, c3)
        # fused decision Linear(256->1) + variable-length mean-pool accumulate
        d = jnp.sum(h3 * wdec, axis=-1, keepdims=True)          # (B, 1)
        acc = acc + jnp.where(t < lens, d, 0.0)
        return (h1, c1, h2, c2, h3, c3, acc)

    z = jnp.zeros((batch, H), jnp.float32)
    acc0 = jnp.zeros((batch, 1), jnp.float32)
    carry = lax.fori_loop(0, seq_len, step, (z, z, z, z, z, z, acc0), unroll=unroll)
    acc = carry[-1]
    # mean over first `len` frames (guard against len == 0); bias commutes.
    inv_len = 1.0 / jnp.maximum(lens, 1).astype(jnp.float32)
    o_ref[...] = acc * inv_len + bdec_ref[...]


def lstm_stack_and_pool(gx1, whh1, w2cat, b2, w3cat, b3, wdec, bdec, lengths,
                        *, hidden=HIDDEN):
    l, b, g4 = gx1.shape
    lens2d = lengths.reshape(b, 1).astype(jnp.int32)

    total_bytes = (gx1.nbytes + whh1.nbytes + w2cat.nbytes + b2.nbytes
                   + w3cat.nbytes + b3.nbytes + wdec.nbytes + bdec.nbytes
                   + lens2d.nbytes + b * 4)

    kern = functools.partial(
        _lstm_stack_decision_kernel,
        hidden=hidden, seq_len=l, batch=b, unroll=bool(l <= 16))

    out = pl.pallas_call(
        kern,
        out_shape=jax.ShapeDtypeStruct((b, 1), jnp.float32),
        grid=(1,),
        in_specs=[
            pl.BlockSpec((l, b, g4), lambda i: (0, 0, 0)),      # gx1 (resident)
            pl.BlockSpec((hidden, g4), lambda i: (0, 0)),       # W_hh1
            pl.BlockSpec((2 * hidden, g4), lambda i: (0, 0)),   # [W_ih2; W_hh2]
            pl.BlockSpec((1, g4), lambda i: (0, 0)),            # b2
            pl.BlockSpec((2 * hidden, g4), lambda i: (0, 0)),   # [W_ih3; W_hh3]
            pl.BlockSpec((1, g4), lambda i: (0, 0)),            # b3
            pl.BlockSpec((1, hidden), lambda i: (0, 0)),        # w_dec
            pl.BlockSpec((1, 1), lambda i: (0, 0)),             # b_dec
            pl.BlockSpec((b, 1), lambda i: (0, 0)),             # lengths
        ],
        out_specs=pl.BlockSpec((b, 1), lambda i: (0, 0)),
        compiler_params=pltpu.CompilerParams(
            dimension_semantics=("arbitrary",),
            vmem_limit_bytes=_vmem_limit_bytes(total_bytes),
        ),
    )(gx1, whh1, w2cat, b2, w3cat, b3, wdec, bdec, lens2d)
    return out[:, 0]


# --------------------------------------------------------------------------
# Parameters (PyTorch-like init) and kernel-side prepared weights
# --------------------------------------------------------------------------
def _init_params(key, dtype=jnp.float32):
    ks = jax.random.split(key, 16)

    def uni(k, shape, bound):
        return jax.random.uniform(k, shape, dtype, -bound, bound)

    p = {}
    b1 = 1.0 / math.sqrt(LMK_DIM)
    p["w1"] = uni(ks[0], (LMK_DIM, FEAT1), b1)
    p["b1"] = uni(ks[1], (1, FEAT1), b1)
    b2 = 1.0 / math.sqrt(FEAT1)
    p["w2"] = uni(ks[2], (FEAT1, FEAT2), b2)
    p["b2"] = uni(ks[3], (1, FEAT2), b2)

    kb = 1.0 / math.sqrt(HIDDEN)
    lstm = []
    idx = 4
    in_size = FEAT2
    for _ in range(NUM_LSTM_LAYERS):
        wih = uni(ks[idx], (in_size, 4 * HIDDEN), kb); idx += 1
        whh = uni(ks[idx], (HIDDEN, 4 * HIDDEN), kb); idx += 1
        bias = uni(ks[idx], (1, 4 * HIDDEN), kb); idx += 1   # b_ih + b_hh combined
        lstm.append((wih, whh, bias))
        in_size = HIDDEN
    p["lstm"] = lstm

    bd = 1.0 / math.sqrt(HIDDEN)
    p["wd"] = uni(ks[idx], (1, HIDDEN), bd); idx += 1
    p["bd"] = uni(ks[idx], (1, 1), bd)
    return p


def _prepare_kernel_params(p):
    """Pad / cast / concatenate once: bf16 weight matrices, f32 biases."""
    kp = {}
    w1p = jnp.zeros((LMK_DIM_PAD, FEAT1), jnp.float32).at[:LMK_DIM].set(p["w1"])
    kp["w1"] = w1p.astype(jnp.bfloat16)                     # K padded 136 -> 256
    kp["b1"] = p["b1"]
    kp["w2"] = p["w2"].astype(jnp.bfloat16)
    kp["b2"] = p["b2"]

    wih1, whh1, bl1 = p["lstm"][0]
    kp["wih1"] = wih1.astype(jnp.bfloat16)
    kp["bl1"] = bl1
    kp["whh1"] = whh1.astype(jnp.bfloat16)

    wih2, whh2, bl2 = p["lstm"][1]
    kp["w2cat"] = jnp.concatenate([wih2, whh2], axis=0).astype(jnp.bfloat16)
    kp["bl2"] = bl2

    wih3, whh3, bl3 = p["lstm"][2]
    kp["w3cat"] = jnp.concatenate([wih3, whh3], axis=0).astype(jnp.bfloat16)
    kp["bl3"] = bl3

    kp["wdec"] = p["wd"]
    kp["bdec"] = p["bd"]
    return kp


class DiscriminatorLmk:
    """JAX/Pallas port of the PyTorch DiscriminatorLmk forward pass."""

    def __init__(self, num_domains=2, *, key):
        self.num_domains = num_domains          # unused in forward, kept for parity
        self.params = _init_params(key)         # f32 "PyTorch" parameters
        self.kernel_params = _prepare_kernel_params(self.params)

    def __call__(self, x, length):
        kp = self.kernel_params
        b, l, m, d = x.shape
        # time-major rows (row index = t*B + b) so reshape back to (L, B, 4H) is direct
        x_rows = jnp.transpose(x, (1, 0, 2, 3)).reshape(l * b, m * d).astype(jnp.float32)
        x_rows = jnp.pad(x_rows, ((0, 0), (0, LMK_DIM_PAD - m * d)))   # K 136 -> 256
        gx1 = mlp_and_layer1_projection(
            x_rows, kp["w1"], kp["b1"], kp["w2"], kp["b2"], kp["wih1"], kp["bl1"])
        gx1 = gx1.reshape(l, b, 4 * HIDDEN)
        pooled = lstm_stack_and_pool(
            gx1, kp["whh1"], kp["w2cat"], kp["bl2"], kp["w3cat"], kp["bl3"],
            kp["wdec"], kp["bdec"], length)                            # (B,)
        return jnp.squeeze(pooled)   # matches torch .squeeze()


# --------------------------------------------------------------------------
# Pure-JAX f32 reference (the PyTorch-spec semantics) for correctness check
# --------------------------------------------------------------------------
def _reference_forward(params, x, lengths):
    b, l, m, d = x.shape
    xf = x.reshape(b * l, m * d).astype(jnp.float32)
    h = jnp.maximum(xf @ params["w1"] + params["b1"], 0.0)
    h = jnp.maximum(h @ params["w2"] + params["b2"], 0.0)
    inp = jnp.swapaxes(h.reshape(b, l, FEAT2), 0, 1)          # (L, B, 512)
    H = HIDDEN
    for (wih, whh, bias) in params["lstm"]:
        def step(carry, x_t):
            hh, cc = carry
            gates = x_t @ wih + hh @ whh + bias[0]
            i = jax.nn.sigmoid(gates[:, :H])
            f = jax.nn.sigmoid(gates[:, H:2 * H])
            g = jnp.tanh(gates[:, 2 * H:3 * H])
            o = jax.nn.sigmoid(gates[:, 3 * H:])
            cc = f * cc + i * g
            hh = o * jnp.tanh(cc)
            return (hh, cc), hh
        init = (jnp.zeros((b, H), jnp.float32), jnp.zeros((b, H), jnp.float32))
        _, ys = lax.scan(step, init, inp)
        inp = ys                                               # (L, B, 256)
    dec = jnp.einsum("lbh,h->lb", inp, params["wd"][0]) + params["bd"][0, 0]
    mask = (jnp.arange(l)[:, None] < lengths[None, :]).astype(jnp.float32)
    pooled = jnp.sum(dec * mask, axis=0) / lengths.astype(jnp.float32)
    return jnp.squeeze(pooled)


if __name__ == "__main__":
    key = jax.random.PRNGKey(0)
    k_param, k_x = jax.random.split(key, 2)

    B, L = 2, 8
    x = jax.random.normal(k_x, (B, L, 68, 2), dtype=jnp.float32)
    lengths = jnp.array([8, 5], dtype=jnp.int32)

    model = DiscriminatorLmk(num_domains=2, key=k_param)
    out = jax.block_until_ready(model(x, lengths))

    with jax.default_matmul_precision("float32"):
        ref = jax.block_until_ready(_reference_forward(model.params, x, lengths))

    # Kernels intentionally use bf16 MXU passes (bf16 weights + activations,
    # f32 accumulate) per perf guidance; tolerance reflects that vs. the f32 ref.
    assert out.shape == ref.shape, (out.shape, ref.shape)
    assert bool(jnp.allclose(out, ref, rtol=1e-2, atol=1e-2)), (out, ref)
    print("KERNEL_OK")
</pallas_src>

<mosaic_0001>
module attributes {stable_mosaic.version = 11 : i64} {
  func.func @_mlp_proj_kernel(%arg0: i32, %arg1: memref<8x256xf32, #tpu.memory_space<vmem>>, %arg2: memref<256x256xbf16, #tpu.memory_space<vmem>>, %arg3: memref<1x256xf32, #tpu.memory_space<vmem>>, %arg4: memref<256x512xbf16, #tpu.memory_space<vmem>>, %arg5: memref<1x512xf32, #tpu.memory_space<vmem>>, %arg6: memref<512x1024xbf16, #tpu.memory_space<vmem>>, %arg7: memref<1x1024xf32, #tpu.memory_space<vmem>>, %arg8: memref<8x1024xf32, #tpu.memory_space<vmem>>) attributes {dimension_semantics = [#tpu.dimension_semantics<parallel>], iteration_bounds = array<i64: 2>, scalar_prefetch = 0 : i64, scratch_operands = 0 : i64, tpu.core_type = #tpu.core_type<tc>, window_params = [{transform_indices = @transform_0, window_bounds = array<i64: 8, 256>}, {pipeline_mode = #tpu.pipeline_mode<synchronous>, transform_indices = @transform_1, window_bounds = array<i64: 256, 256>}, {pipeline_mode = #tpu.pipeline_mode<synchronous>, transform_indices = @transform_2, window_bounds = array<i64: 1, 256>}, {pipeline_mode = #tpu.pipeline_mode<synchronous>, transform_indices = @transform_3, window_bounds = array<i64: 256, 512>}, {pipeline_mode = #tpu.pipeline_mode<synchronous>, transform_indices = @transform_4, window_bounds = array<i64: 1, 512>}, {pipeline_mode = #tpu.pipeline_mode<synchronous>, transform_indices = @transform_5, window_bounds = array<i64: 512, 1024>}, {pipeline_mode = #tpu.pipeline_mode<synchronous>, transform_indices = @transform_6, window_bounds = array<i64: 1, 1024>}, {transform_indices = @transform_7, window_bounds = array<i64: 8, 1024>}]} {
    %c0 = arith.constant 0 : index
    %c0_0 = arith.constant 0 : index
    %0 = vector.load %arg1[%c0, %c0_0] : memref<8x256xf32, #tpu.memory_space<vmem>>, vector<8x256xf32>
    %1 = arith.truncf %0 : vector<8x256xf32> to vector<8x256xbf16>
    %c0_1 = arith.constant 0 : index
    %c0_2 = arith.constant 0 : index
    %2 = vector.load %arg2[%c0_1, %c0_2] : memref<256x256xbf16, #tpu.memory_space<vmem>>, vector<256x256xbf16>
    %cst = arith.constant dense<0.000000e+00> : vector<8x256xf32>
    %3 = tpu.matmul %1, %2, %cst {dimension_numbers = #tpu.dot_dimension_numbers<[1], [0], [0], [1], [0, 0, 1, 1], [], []>} : vector<8x256xbf16>, vector<256x256xbf16>, vector<8x256xf32> -> vector<8x256xf32>
    %c0_3 = arith.constant 0 : index
    %c0_4 = arith.constant 0 : index
    %4 = vector.load %arg3[%c0_3, %c0_4] : memref<1x256xf32, #tpu.memory_space<vmem>>, vector<1x256xf32>
    %5 = vector.broadcast %4 : vector<1x256xf32> to vector<8x256xf32>
    %6 = arith.addf %3, %5 : vector<8x256xf32>
    %cst_5 = arith.constant 0.000000e+00 : f32
    %7 = vector.broadcast %cst_5 : f32 to vector<8x256xf32>
    %8 = arith.maximumf %6, %7 : vector<8x256xf32>
    %9 = arith.truncf %8 : vector<8x256xf32> to vector<8x256xbf16>
    %c0_6 = arith.constant 0 : index
    %c0_7 = arith.constant 0 : index
    %10 = vector.load %arg4[%c0_6, %c0_7] : memref<256x512xbf16, #tpu.memory_space<vmem>>, vector<256x512xbf16>
    %cst_8 = arith.constant dense<0.000000e+00> : vector<8x512xf32>
    %11 = tpu.matmul %9, %10, %cst_8 {dimension_numbers = #tpu.dot_dimension_numbers<[1], [0], [0], [1], [0, 0, 1, 1], [], []>} : vector<8x256xbf16>, vector<256x512xbf16>, vector<8x512xf32> -> vector<8x512xf32>
    %c0_9 = arith.constant 0 : index
    %c0_10 = arith.constant 0 : index
    %12 = vector.load %arg5[%c0_9, %c0_10] : memref<1x512xf32, #tpu.memory_space<vmem>>, vector<1x512xf32>
    %13 = vector.broadcast %12 : vector<1x512xf32> to vector<8x512xf32>
    %14 = arith.addf %11, %13 : vector<8x512xf32>
    %cst_11 = arith.constant 0.000000e+00 : f32
    %15 = vector.broadcast %cst_11 : f32 to vector<8x512xf32>
    %16 = arith.maximumf %14, %15 : vector<8x512xf32>
    %17 = arith.truncf %16 : vector<8x512xf32> to vector<8x512xbf16>
    %c0_12 = arith.constant 0 : index
    %c0_13 = arith.constant 0 : index
    %18 = vector.load %arg6[%c0_12, %c0_13] : memref<512x1024xbf16, #tpu.memory_space<vmem>>, vector<512x1024xbf16>
    %cst_14 = arith.constant dense<0.000000e+00> : vector<8x1024xf32>
    %19 = tpu.matmul %17, %18, %cst_14 {dimension_numbers = #tpu.dot_dimension_numbers<[1], [0], [0], [1], [0, 0, 1, 1], [], []>} : vector<8x512xbf16>, vector<512x1024xbf16>, vector<8x1024xf32> -> vector<8x1024xf32>
    %c0_15 = arith.constant 0 : index
    %c0_16 = arith.constant 0 : index
    %20 = vector.load %arg7[%c0_15, %c0_16] : memref<1x1024xf32, #tpu.memory_space<vmem>>, vector<1x1024xf32>
    %21 = vector.broadcast %20 : vector<1x1024xf32> to vector<8x1024xf32>
    %22 = arith.addf %19, %21 : vector<8x1024xf32>
    %c0_17 = arith.constant 0 : index
    %c0_18 = arith.constant 0 : index
    %23 = vector.load %arg8[%c0_17, %c0_18] : memref<8x1024xf32, #tpu.memory_space<vmem>>, vector<8x1024xf32>
    tpu.vector_store %arg8[%c0_17, %c0_18], %22 {strides = array<i32>} : memref<8x1024xf32, #tpu.memory_space<vmem>>, vector<8x1024xf32>,
    return
  }
  func.func @transform_0(%arg0: i32) -> (i32, i32) {
    %c0_i32 = arith.constant 0 : i32
    %c0_i32_0 = arith.constant 0 : i32
    return %arg0, %c0_i32 : i32, i32
  }
  func.func @transform_1(%arg0: i32) -> (i32, i32) {
    %c0_i32 = arith.constant 0 : i32
    %c0_i32_0 = arith.constant 0 : i32
    %c0_i32_1 = arith.constant 0 : i32
    return %c0_i32, %c0_i32_0 : i32, i32
  }
  func.func @transform_2(%arg0: i32) -> (i32, i32) {
    %c0_i32 = arith.constant 0 : i32
    %c0_i32_0 = arith.constant 0 : i32
    %c0_i32_1 = arith.constant 0 : i32
    return %c0_i32, %c0_i32_0 : i32, i32
  }
  func.func @transform_3(%arg0: i32) -> (i32, i32) {
    %c0_i32 = arith.constant 0 : i32
    %c0_i32_0 = arith.constant 0 : i32
    %c0_i32_1 = arith.constant 0 : i32
    return %c0_i32, %c0_i32_0 : i32, i32
  }
  func.func @transform_4(%arg0: i32) -> (i32, i32) {
    %c0_i32 = arith.constant 0 : i32
    %c0_i32_0 = arith.constant 0 : i32
    %c0_i32_1 = arith.constant 0 : i32
    return %c0_i32, %c0_i32_0 : i32, i32
  }
  func.func @transform_5(%arg0: i32) -> (i32, i32) {
    %c0_i32 = arith.constant 0 : i32
    %c0_i32_0 = arith.constant 0 : i32
    %c0_i32_1 = arith.constant 0 : i32
    return %c0_i32, %c0_i32_0 : i32, i32
  }
  func.func @transform_6(%arg0: i32) -> (i32, i32) {
    %c0_i32 = arith.constant 0 : i32
    %c0_i32_0 = arith.constant 0 : i32
    %c0_i32_1 = arith.constant 0 : i32
    return %c0_i32, %c0_i32_0 : i32, i32
  }
  func.func @transform_7(%arg0: i32) -> (i32, i32) {
    %c0_i32 = arith.constant 0 : i32
    %c0_i32_0 = arith.constant 0 : i32
    return %arg0, %c0_i32 : i32, i32
  }
}

</mosaic_0001>

<bundles_post_ra>
// kernel: tpu_custom_call.1
= control target key start
LH: loop header
LB: loop body
LE: loop exit
PB: predicated region body
PF: predicated region fallthrough
CT: control target
= control target key end

     0   :  { %s5804_s0 = inlined_call_operand.hbm [shape: f32[16,256], index: 0, kind: input, shape index: {}]   ;;  %s5805_s1 = inlined_call_operand.hbm [shape: bf16[256,256], index: 1, kind: input, shape index: {}]   ;;  %s5806_s2 = inlined_call_operand.hbm [shape: f32[1,256], index: 2, kind: input, shape index: {}]   ;;  %s5807_s3 = inlined_call_operand.hbm [shape: bf16[256,512], index: 3, kind: input, shape index: {}]   ;;  %s5808_s4 = inlined_call_operand.hbm [shape: f32[1,512], index: 4, kind: input, shape index: {}]   ;;  %s5809_s5 = inlined_call_operand.hbm [shape: bf16[512,1024], index: 5, kind: input, shape index: {}]   ;;  %s5810_s6 = inlined_call_operand.hbm [shape: f32[1,1024], index: 6, kind: input, shape index: {}]   ;;  %s5811_s7 = inlined_call_operand.hbm [shape: f32[16,1024], index: 7, kind: output, shape index: {}]  }
   0x1   :  { %5812 = sst [smem:[#allocation20_spill]] %s5805_s1 }
   0x2   :  { %5813 = sst [smem:[#allocation21_spill]] %s5806_s2 }
   0x3   :  { %12 = vsyncpa [#allocation3], 0 }
   0x4   :  { %14 = vsyncpa [#allocation3 + $0x1], 0 }
   0x5   :  { %15 = vsyncpa [#allocation6], 0 }
   0x6   :  { %16 = vsyncpa [#allocation9], 0 }
   0x7   :  { %17 = vsyncpa [#allocation12], 0 }
   0x8   :  { %18 = vsyncpa [#allocation4], 0 }
   0x9   :  { %20 = vsyncpa [#allocation4 + $0x1], 0  ;;  %s5519_s24 = smov 0   ;;  %s5521_s25 = smov 0  }
   0xa   :  { %s5523_s26 = smov 0   ;;  %s5525_s27 = smov 0  }
   0xb LB: > { %s5814_s1 = sld [smem:[#allocation20_spill]]  ;;  %s5543_s8 = sadd.s32 4294967295, %s5465_s27   ;;  %s5465_s27 = sphi %s5525_s27, %s5827_s27   ;;  %s5461_s26 = sphi %s5523_s26, %s5826_s26   ;;  %s5457_s25 = sphi %s5521_s25, %s5825_s25   ;;  %s5453_s24 = sphi %s5519_s24, %s5824_s24  }
   0xc   : > { %p3277_p0 = scmp.ge.s32.totalorder %s5465_s27, 1  ;;  %p47_p1 = scmp.eq.s32.totalorder %s5543_s8, 0 }
   0xd   : > { %p209_p2 = scmp.lt.s32.totalorder %s5465_s27, 3  ;;  %s5467_s10 = smov [#allocation5]  }
   0xe   : > { %s222_s11 = sshll.u32 %s5467_s10, 4  ;;  %s246_s14 = sshll.u32 %s5807_s3, 4  ;;  %s223_s11 = int_to_ptr.vmem [resolvable:$true] %s222_s11  ;;  %s247_s14 = int_to_ptr.hbm [resolvable:$true] %s246_s14 }
   0xf   : > { %p5548_p3 = pnand %p3277_p0, %p209_p2  ;;  %s5468_s16 = smov [#allocation8]  }
  0x10   : > { %s248_s17 = sshll.u32 %s5468_s16, 4  ;;  %s5469_s18 = smov 128   ;;  %s249_s17 = int_to_ptr.vmem [resolvable:$true] %s248_s17 }
  0x11   : > { %s220_s30 = sshll.u32 %s5814_s1, 4  ;;  %p5092_p4 = pneg %p5548_p3  ;;  %s221_s30 = int_to_ptr.hbm [resolvable:$true] %s220_s30 }
  0x12   : > { %s5470_s19 = smov 8   ;;  %s5471_s20 = smov 256  }
  0x13   : > { %p5560_p6 = pnand %p5092_p4, %p47_p1  ;;  %s5472_s21 = smov 16  }
  0x14   : > { %s272_s28 = sshll.u32 %s5809_s5, 4  ;;  %s5473_s29 = smov [#allocation11]   ;;  %s273_s28 = int_to_ptr.hbm [resolvable:$true] %s272_s28 }
  0x15   : > { %5095 = dma.hbm_to_vmem [thread:$0]  (!%p5560_p6), %s221_s30, 4096, %s223_s11, [#allocation6], %s5469_s18, %s5469_s18, %s5470_s19  }
  0x16   : > { %5101 = dma.hbm_to_vmem [thread:$0]  (!%p5560_p6), %s247_s14, 8192, %s249_s17, [#allocation9], %s5471_s20, %s5471_s20, %s5472_s21  }
  0x17   : > { %s274_s10 = sshll.u32 %s5473_s29, 4  ;;  %s5817_s2 = sld [smem:[#allocation21_spill]]  ;;  %s275_s10 = int_to_ptr.vmem [resolvable:$true] %s274_s10 }
  0x18   : > { %s5474_s30 = smov 512   ;;  %s5475_s11 = smov 32  }
  0x19   : > { %5107 = dma.hbm_to_vmem [thread:$0]  (!%p5560_p6), %s273_s28, 32768, %s275_s10, [#allocation12], %s5474_s30, %s5474_s30, %s5475_s11  }
  0x1a   : > { %s5476_s14 = smov [#allocation7]   ;;  %s261_s20 = sshll.u32 %s5808_s4, 4  ;;  %s262_s20 = int_to_ptr.hbm [resolvable:$true] %s261_s20 }
  0x1b   : > { %s237_s17 = sshll.u32 %s5476_s14, 4  ;;  %s287_s23 = sshll.u32 %s5810_s6, 4  ;;  %s238_s17 = int_to_ptr.vmem [resolvable:$true] %s237_s17  ;;  %s288_s23 = int_to_ptr.hbm [resolvable:$true] %s287_s23 }
  0x1c   : > { %s5477_s28 = smov [#allocation10]   ;;  %s5478_s10 = smov [#allocation13]  }
  0x1d   : > { %s235_s16 = sshll.u32 %s5817_s2, 4  ;;  %s263_s29 = sshll.u32 %s5477_s28, 4  ;;  %s236_s16 = int_to_ptr.hbm [resolvable:$true] %s235_s16  ;;  %s264_s29 = int_to_ptr.vmem [resolvable:$true] %s263_s29 }
  0x1e   : > { %5098 = dma.hbm_to_vmem [thread:$0]  (!%p5560_p6), %s236_s16, 32, %s238_s17, [#allocation6]  }
  0x1f   : > { %5104 = dma.hbm_to_vmem [thread:$0]  (!%p5560_p6), %s262_s20, 64, %s264_s29, [#allocation9]  }
  0x20   : > { %s289_s12 = sshll.u32 %s5478_s10, 4  ;;  %s3276_s13 = sadd.s32 4294967294, %s5465_s27   ;;  %s290_s12 = int_to_ptr.vmem [resolvable:$true] %s289_s12 }
  0x21   : > { %5110 = dma.hbm_to_vmem [thread:$0]  (!%p5560_p6), %s288_s23, 128, %s290_s12, [#allocation12]  }
  0x22   : > { %s5590_s16 = sadd.s32 1, %s5465_s27   ;;  %s33_s11 = sadd.s32 1, %s5461_s26 }
  0x23   : > { %s30_s30 = ssub.s32 %s5465_s27, %s5590_s16  ;;  %p40_p8 = scmp.ne.s32.totalorder %s5461_s26, %s5457_s25 }
  0x24   : > { %p31_p7 = scmp.eq.s32.totalorder %s30_s30, 0  ;;  %p41_p9 = scmp.eq.s32.totalorder %s5465_s27, 0 }
  0x25   : > { %p46_p10 = scmp.ne.s32.totalorder %s5457_s25, %s5453_s24  ;;  %p196_p13 = scmp.eq.s32.totalorder %s5543_s8, 1 }
  0x26   : > { %s5601_s14 = scalar_select %p31_p7, %s5461_s26, %s33_s11  }
  0x27   : > { %p5603_p11 = por %p41_p9, %p40_p8  ;;  %p5609_p12 = por %p47_p1, %p46_p10 }
  0x28   : > { %p202_p0 = scmp.eq.s32.totalorder %s3276_s13, 1  ;;  %p5125_p2 = scmp.lt.s32.totalorder %s5465_s27, 2 }
  0x29   : > { %s300_s18 = sand.u32 1, %s5461_s26   ;;  %p5616_p4 = por %p196_p13, %p40_p8 }
  0x2a   : > { %p5620_p6 = por %p202_p0, %p46_p10  ;;  %s3285_s21 = sshll.u32 %s300_s18, 4 }
  0x2b   : > { %s4710_s22 = sshll.u32 %s5465_s27, 4  ;;  %s304_s10 = scalar_lea.vmem [#allocation2], %s3285_s21 }
  0x2c   : > { %s309_s29 = scalar_lea.hbm %s5804_s0, %s4710_s22  ;;  %s313_s12 = sshll.u32 %s304_s10, 4  ;;  %s314_s12 = int_to_ptr.vmem [resolvable:$true] %s313_s12 }
  0x2d   : > { %s311_s30 = sshll.u32 %s309_s29, 4  ;;  %p5630_p7 = pnand %p5125_p2, %p5603_p11  ;;  %s312_s30 = int_to_ptr.hbm [resolvable:$true] %s311_s30 }
  0x2e   : > { %s301_s11 = scalar_lea.sflag [#allocation3], %s300_s18  ;;  %s5357_s1 = sshra.s32 %s312_s30, 4  ;;  %s5358_s1 = int_to_ptr.hbm [resolvable:$true] %s5357_s1 }
  0x2f   : > { %s5359_s2 = scalar_lea.hbm %s5358_s1, 16  ;;  %p5361_p9 = pneg %p5630_p7 }
  0x30   : > { %p5360_p8 = scmp.ne.s32.totalorder %s5358_s1, %s5359_s2  ;;  %s5364_s23 = scalar_lea.hbm %s5804_s0, 32 }
  0x31   : > { %p5365_p11 = scmp.lt.s32.totalorder %s5358_s1, %s5804_s0  ;;  %p5366_p0 = scmp.lt.s32.totalorder %s5364_s23, %s5359_s2 }
  0x32   : > { %p5362_p10 = pnand %p5361_p9, %p5360_p8 }
  0x33   : > { %p5367_p2 = por %p5366_p0, %p5365_p11 }
  0x34   : > { %p5363_p13 = pneg %p5362_p10 }
  0x36   : > { %p5368_p5 = pnand %p5367_p2, %p5363_p13 }
  0x38   : > { %5371 = shalt.err (!%p5368_p5)
}
  0x39   : > { %5114 = dma.hbm_to_vmem [thread:$0]  (!%p5630_p7), %s312_s30, 256, %s314_s12, %s301_s11  }
  0x3a   : > { %322 = sbr.rel (%p5548_p3) target bundleno = 732 (0x2dc), region = 48  ;;  %s5647_s18 = sand.u32 (!%p5548_p3), 1, %s5457_s25  }
  0x3b   : > { %s3289_s29 = sshll.u32 (!%p5548_p3), %s5647_s18, 4  ;;  %s325_s10 = scalar_lea.sflag (!%p5548_p3), [#allocation3], %s5647_s18 }
  0x3c   : > { %s5651_s21 = scalar_lea.vmem (!%p5548_p3), [#allocation2], %s3289_s29 }
  0x3f   : > { %5432 = dma.done.wait (%p5609_p12), %s325_s10, 256  }
  0x40   : > { %5434 = vsyncadd (%p5609_p12), %s325_s10, 4294967040 }
  0x41   : > { %5436 = dma.done.wait (%p47_p1), [#allocation6], 4128  }
  0x42   : > { %5438 = vsyncadd (%p47_p1), [#allocation6], 4294963168 }
  0x43   : > { %5440 = dma.done.wait (%p47_p1), [#allocation9], 8256  }
  0x44   : > { %5442 = vsyncadd (%p47_p1), [#allocation9], 4294959040 }
  0x45   : > { %5444 = dma.done.wait (%p47_p1), [#allocation12], 32896  }
  0x46   : > { %5446 = vsyncadd (%p47_p1), [#allocation12], 4294934400  ;;  %v3355_v0 = vld [vmem:[#allocation5 + $0x70] sm:$0xf]  ;;  %v4726_v1 = vld [vmem:[#allocation5 + $0x74] sm:$0xf0] }
  0x47   : > { %v3419_v2 = vld [vmem:[#allocation5 + $0xf0] sm:$0xf]  ;;  %v3356_v3 = vor.u32 %v4726_v1, %v3355_v0  ;;  %v4742_v4 = vld [vmem:[#allocation5 + $0xf4] sm:$0xf0]  ;;  %v4725_v5 = vld [vmem:[#allocation5 + $0x74] sm:$0xf] }
  0x48   : > { %v3357_v6 = vld [vmem:[#allocation5 + $0x78] sm:$0xf0]  ;;  %v3420_v7 = vor.u32 %v4742_v4, %v3419_v2  ;;  %v4741_v9 = vld [vmem:[#allocation5 + $0xf4] sm:$0xf]  ;;  %v3347_v11 = vld [vmem:[#allocation5 + $0x60] sm:$0xf] }
  0x49   : > { %v3360_v8 = vor.u32 %v4725_v5, %v3357_v6  ;;  %v3421_v10 = vld [vmem:[#allocation5 + $0xf8] sm:$0xf0]  ;;  %592 = vmatpush.bf16.msra.mxu0 %v3356_v3  ;;  %v4724_v13 = vld [vmem:[#allocation5 + $0x64] sm:$0xf0]  ;;  %v3411_v14 = vld [vmem:[#allocation5 + $0xe0] sm:$0xf] }
  0x4a   : > { %v3424_v12 = vor.u32 %v4741_v9, %v3421_v10  ;;  %v4740_v15 = vld [vmem:[#allocation5 + $0xe4] sm:$0xf0]  ;;  %605 = vmatpush.bf16.msra.mxu1 %v3420_v7  ;;  %v3348_v16 = vor.u32 %v4724_v13, %v3347_v11  ;;  %v4723_v18 = vld [vmem:[#allocation5 + $0x64] sm:$0xf]  ;;  %v3349_v19 = vld [vmem:[#allocation5 + $0x68] sm:$0xf0] }
  0x4b   : > { %618 = vmatpush.bf16.msra.mxu2 %v3360_v8  ;;  %v3412_v17 = vor.u32 %v4740_v15, %v3411_v14  ;;  %v4739_v20 = vld [vmem:[#allocation5 + $0xe4] sm:$0xf]  ;;  %v3352_v21 = vor.u32 %v4723_v18, %v3349_v19  ;;  %v3413_v22 = vld [vmem:[#allocation5 + $0xe8] sm:$0xf0]  ;;  %v3339_v23 = vld [vmem:[#allocation5 + $0x50] sm:$0xf] }
  0x4c   : > { %631 = vmatpush.bf16.msra.mxu3 %v3424_v12  ;;  %v4722_v24 = vld [vmem:[#allocation5 + $0x54] sm:$0xf0]  ;;  %v3416_v25 = vor.u32 %v4739_v20, %v3413_v22  ;;  %v3403_v26 = vld [vmem:[#allocation5 + $0xd0] sm:$0xf]  ;;  %v4721_v28 = vld [vmem:[#allocation5 + $0x54] sm:$0xf] }
  0x4d   : > { %v4738_v27 = vld [vmem:[#allocation5 + $0xd4] sm:$0xf0]  ;;  %593 = vmatpush.bf16.msra.mxu0 %v3348_v16  ;;  %v3340_v29 = vor.u32 %v4722_v24, %v3339_v23  ;;  %v3341_v30 = vld [vmem:[#allocation5 + $0x58] sm:$0xf0]  ;;  %v4737_v31 = vld [vmem:[#allocation5 + $0xd4] sm:$0xf] }
  0x4e   : > { %v3405_v32 = vld [vmem:[#allocation5 + $0xd8] sm:$0xf0]  ;;  %606 = vmatpush.bf16.msra.mxu1 %v3412_v17  ;;  %v3404_v33 = vor.u32 %v4738_v27, %v3403_v26  ;;  %v3344_v34 = vor.u32 %v4721_v28, %v3341_v30  ;;  %v3331_v35 = vld [vmem:[#allocation5 + $0x40] sm:$0xf]  ;;  %v4720_v36 = vld [vmem:[#allocation5 + $0x44] sm:$0xf0] }
  0x4f   : > { %619 = vmatpush.bf16.msra.mxu2 %v3352_v21  ;;  %v3395_v37 = vld [vmem:[#allocation5 + $0xc0] sm:$0xf]  ;;  %v3408_v38 = vor.u32 %v4737_v31, %v3405_v32  ;;  %v4736_v39 = vld [vmem:[#allocation5 + $0xc4] sm:$0xf0]  ;;  %v4719_v40 = vld [vmem:[#allocation5 + $0x44] sm:$0xf]  ;;  %v3332_v44 = vor.u32 %v4720_v36, %v3331_v35 }
  0x50   : > { %632 = vmatpush.bf16.msra.mxu3 %v3416_v25  ;;  %v3333_v41 = vld [vmem:[#allocation5 + $0x48] sm:$0xf0]  ;;  %v4735_v42 = vld [vmem:[#allocation5 + $0xc4] sm:$0xf]  ;;  %v3396_v45 = vor.u32 %v4736_v39, %v3395_v37  ;;  %v3323_v47 = vld [vmem:[#allocation5 + $0x30] sm:$0xf] }
  0x51   : > { %v3397_v43 = vld [vmem:[#allocation5 + $0xc8] sm:$0xf0]  ;;  %594 = vmatpush.bf16.msra.mxu0 %v3340_v29  ;;  %v3336_v46 = vor.u32 %v4719_v40, %v3333_v41  ;;  %v4718_v48 = vld [vmem:[#allocation5 + $0x34] sm:$0xf0]  ;;  %v3387_v49 = vld [vmem:[#allocation5 + $0xb0] sm:$0xf] }
  0x52   : > { %607 = vmatpush.bf16.msra.mxu1 %v3404_v33  ;;  %v3400_v50 = vor.u32 %v4735_v42, %v3397_v43  ;;  %v4734_v51 = vld [vmem:[#allocation5 + $0xb4] sm:$0xf0]  ;;  %v4717_v52 = vld [vmem:[#allocation5 + $0x34] sm:$0xf]  ;;  %v3325_v53 = vld [vmem:[#allocation5 + $0x38] sm:$0xf0]  ;;  %v3324_v56 = vor.u32 %v4718_v48, %v3323_v47 }
  0x53   : > { %620 = vmatpush.bf16.msra.mxu2 %v3344_v34  ;;  %v4733_v54 = vld [vmem:[#allocation5 + $0xb4] sm:$0xf]  ;;  %v3389_v55 = vld [vmem:[#allocation5 + $0xb8] sm:$0xf0]  ;;  %v3388_v57 = vor.u32 %v4734_v51, %v3387_v49  ;;  %v3328_v58 = vor.u32 %v4717_v52, %v3325_v53  ;;  %v3315_v59 = vld [vmem:[#allocation5 + $0x20] sm:$0xf] }
  0x54   : > { %633 = vmatpush.bf16.msra.mxu3 %v3408_v38  ;;  %v4716_v60 = vld [vmem:[#allocation5 + $0x24] sm:$0xf0]  ;;  %v3379_v61 = vld [vmem:[#allocation5 + $0xa0] sm:$0xf]  ;;  %v3392_v62 = vor.u32 %v4733_v54, %v3389_v55  ;;  %v4715_v0 = vld [vmem:[#allocation5 + $0x24] sm:$0xf] }
  0x55   : > { %595 = vmatpush.bf16.msra.mxu0 %v3332_v44  ;;  %v4732_v63 = vld [vmem:[#allocation5 + $0xa4] sm:$0xf0]  ;;  %v3317_v1 = vld [vmem:[#allocation5 + $0x28] sm:$0xf0]  ;;  %v4731_v2 = vld [vmem:[#allocation5 + $0xa4] sm:$0xf]  ;;  %v3316_v4 = vor.u32 %v4716_v60, %v3315_v59 }
  0x56   : > { %608 = vmatpush.bf16.msra.mxu1 %v3396_v45  ;;  %v3381_v3 = vld [vmem:[#allocation5 + $0xa8] sm:$0xf0]  ;;  %v3380_v5 = vor.u32 %v4732_v63, %v3379_v61  ;;  %v3320_v6 = vor.u32 %v4715_v0, %v3317_v1  ;;  %v3307_v7 = vld [vmem:[#allocation5 + $0x10] sm:$0xf]  ;;  %v4714_v8 = vld [vmem:[#allocation5 + $0x14] sm:$0xf0] }
  0x57   : > { %621 = vmatpush.bf16.msra.mxu2 %v3336_v46  ;;  %v3371_v9 = vld [vmem:[#allocation5 + $0x90] sm:$0xf]  ;;  %v3384_v10 = vor.u32 %v4731_v2, %v3381_v3  ;;  %v4730_v11 = vld [vmem:[#allocation5 + $0x94] sm:$0xf0]  ;;  %v4713_v12 = vld [vmem:[#allocation5 + $0x14] sm:$0xf]  ;;  %v3308_v16 = vor.u32 %v4714_v8, %v3307_v7 }
  0x58   : > { %634 = vmatpush.bf16.msra.mxu3 %v3400_v50  ;;  %v3309_v13 = vld [vmem:[#allocation5 + $0x18] sm:$0xf0]  ;;  %v4729_v14 = vld [vmem:[#allocation5 + $0x94] sm:$0xf]  ;;  %v3299_v17 = vld [vmem:[#allocation5] sm:$0xf]  ;;  %v3372_v18 = vor.u32 %v4730_v11, %v3371_v9 }
  0x59   : > { %596 = vmatpush.bf16.msra.mxu0 %v3324_v56  ;;  %v3373_v15 = vld [vmem:[#allocation5 + $0x98] sm:$0xf0]  ;;  %v3312_v19 = vor.u32 %v4713_v12, %v3309_v13  ;;  %v4712_v20 = vld [vmem:[#allocation5 + $0x4] sm:$0xf0]  ;;  %v3363_v21 = vld [vmem:[#allocation5 + $0x80] sm:$0xf] }
  0x5a   : > { %609 = vmatpush.bf16.msra.mxu1 %v3388_v57  ;;  %v4728_v22 = vld [vmem:[#allocation5 + $0x84] sm:$0xf0]  ;;  %v3376_v23 = vor.u32 %v4729_v14, %v3373_v15  ;;  %v4711_v24 = vld [vmem:[#allocation5 + $0x4] sm:$0xf]  ;;  %v3301_v25 = vld [vmem:[#allocation5 + $0x8] sm:$0xf0]  ;;  %v3300_v30 = vor.u32 %v4712_v20, %v3299_v17 }
  0x5b   : > { %622 = vmatpush.bf16.msra.mxu2 %v3328_v58  ;;  %v4727_v26 = vld [vmem:[#allocation5 + $0x84] sm:$0xf]  ;;  %v3365_v27 = vld [vmem:[#allocation5 + $0x88] sm:$0xf0]  ;;  %v4773_v29 = vld [vmem:[#allocation8 + $0xec] sm:$0xf0]  ;;  %v3364_v34 = vor.u32 %v4728_v22, %v3363_v21  ;;  %v3304_v35 = vor.u32 %v4711_v24, %v3301_v25 }
  0x5c   : > { %635 = vmatpush.bf16.msra.mxu3 %v3392_v62  ;;  %v3539_v28 = vld [vmem:[#allocation8 + $0xe0] sm:$0xf]  ;;  %v4771_v32 = vld [vmem:[#allocation8 + $0xe4] sm:$0xf]  ;;  %v3541_v33 = vld [vmem:[#allocation8 + $0xf0] sm:$0xf0]  ;;  %v3368_v37 = vor.u32 %v4727_v26, %v3365_v27 }
  0x5d   : > { %597 = vmatpush.bf16.msra.mxu0 %v3316_v4  ;;  %v390_v31 = vld [vmem:[%s5651_s21] sm:$0xff]  ;;  %v391_v36 = vld [vmem:[%s5651_s21 + $0x8] sm:$0xff]  ;;  %v3540_v38 = vor.u32 %v4773_v29, %v3539_v28  ;;  %v3544_v43 = vor.u32 %v4771_v32, %v3541_v33  ;;  %s3296_s1 = sshll.u32 %s5647_s18, 6  ;;  %s5063_s9 = sshll.u32 %s5543_s8, 6 }
  0x5e   : > { %610 = vmatpush.bf16.msra.mxu1 %v3380_v5  ;;  %v3523_v39 = vld [vmem:[#allocation8 + $0xc0] sm:$0xf]  ;;  %v4805_v41 = vld [vmem:[#allocation8 + $0x1ec] sm:$0xf0]  ;;  %v392_v42 = vpack.c.bf16 %v390_v31, %v390_v31  ;;  %v4803_v45 = vld [vmem:[#allocation8 + $0x1e4] sm:$0xf]  ;;  %v393_v47 = vpack.c.bf16 %v391_v36, %v391_v36  ;;  %s3144_s30 = scalar_lea.hbm %s5811_s7, %s5063_s9 }
  0x5f   : > { %623 = vmatpush.bf16.msra.mxu2 %v3320_v6  ;;  %v3667_v40 = vld [vmem:[#allocation8 + $0x1e0] sm:$0xf]  ;;  %v4769_v44 = vld [vmem:[#allocation8 + $0xcc] sm:$0xf0]  ;;  %v3669_v46 = vld [vmem:[#allocation8 + $0x1f0] sm:$0xf0] }
  0x60   : > { %636 = vmatpush.bf16.msra.mxu3 %v3384_v10  ;;  %v4767_v48 = vld [vmem:[#allocation8 + $0xc4] sm:$0xf]  ;;  %v3525_v49 = vld [vmem:[#allocation8 + $0xd0] sm:$0xf0]  ;;  %v3668_v50 = vor.u32 %v4805_v41, %v3667_v40  ;;  %v3524_v51 = vor.u32 %v4769_v44, %v3523_v39  ;;  %v3672_v52 = vor.u32 %v4803_v45, %v3669_v46  ;;  %v3507_v53 = vld [vmem:[#allocation8 + $0xa0] sm:$0xf] }
  0x61   : > { %598 = vmatpush.bf16.msra.mxu0 %v3308_v16  ;;  %v3651_v54 = vld [vmem:[#allocation8 + $0x1c0] sm:$0xf]  ;;  %v4801_v55 = vld [vmem:[#allocation8 + $0x1cc] sm:$0xf0]  ;;  %v3528_v56 = vor.u32 %v4767_v48, %v3525_v49  ;;  %v4799_v58 = vld [vmem:[#allocation8 + $0x1c4] sm:$0xf] }
  0x62   : > { %611 = vmatpush.bf16.msra.mxu1 %v3372_v18  ;;  %v4765_v57 = vld [vmem:[#allocation8 + $0xac] sm:$0xf0]  ;;  %v3653_v59 = vld [vmem:[#allocation8 + $0x1d0] sm:$0xf0]  ;;  %v4763_v60 = vld [vmem:[#allocation8 + $0xa4] sm:$0xf]  ;;  %v3652_v62 = vor.u32 %v4801_v55, %v3651_v54 }
  0x63   : > { %624 = vmatpush.bf16.msra.mxu2 %v3312_v19  ;;  %v3509_v61 = vld [vmem:[#allocation8 + $0xb0] sm:$0xf0]  ;;  %v3508_v63 = vor.u32 %v4765_v57, %v3507_v53  ;;  %v3656_v0 = vor.u32 %v4799_v58, %v3653_v59  ;;  %v3491_v1 = vld [vmem:[#allocation8 + $0x80] sm:$0xf]  ;;  %v4797_v3 = vld [vmem:[#allocation8 + $0x1ac] sm:$0xf0] }
  0x64   : > { %637 = vmatpush.bf16.msra.mxu3 %v3376_v23  ;;  %v3635_v2 = vld [vmem:[#allocation8 + $0x1a0] sm:$0xf]  ;;  %v3512_v4 = vor.u32 %v4763_v60, %v3509_v61  ;;  %v4761_v5 = vld [vmem:[#allocation8 + $0x8c] sm:$0xf0]  ;;  %v4795_v6 = vld [vmem:[#allocation8 + $0x1a4] sm:$0xf] }
  0x65   : > { %599 = vmatpush.bf16.msra.mxu0 %v3300_v30  ;;  %v3637_v7 = vld [vmem:[#allocation8 + $0x1b0] sm:$0xf0]  ;;  %v4759_v8 = vld [vmem:[#allocation8 + $0x84] sm:$0xf]  ;;  %v3636_v10 = vor.u32 %v4797_v3, %v3635_v2  ;;  %v3492_v11 = vor.u32 %v4761_v5, %v3491_v1  ;;  %v3475_v13 = vld [vmem:[#allocation8 + $0x60] sm:$0xf] }
  0x66   : > { %612 = vmatpush.bf16.msra.mxu1 %v3364_v34  ;;  %v3493_v9 = vld [vmem:[#allocation8 + $0x90] sm:$0xf0]  ;;  %v3640_v12 = vor.u32 %v4795_v6, %v3637_v7  ;;  %v3619_v14 = vld [vmem:[#allocation8 + $0x180] sm:$0xf]  ;;  %v4793_v15 = vld [vmem:[#allocation8 + $0x18c] sm:$0xf0] }
  0x67   : > { %625 = vmatpush.bf16.msra.mxu2 %v3304_v35  ;;  %v3496_v16 = vor.u32 %v4759_v8, %v3493_v9  ;;  %v4757_v17 = vld [vmem:[#allocation8 + $0x6c] sm:$0xf0]  ;;  %v4791_v18 = vld [vmem:[#allocation8 + $0x184] sm:$0xf]  ;;  %v3621_v19 = vld [vmem:[#allocation8 + $0x190] sm:$0xf0]  ;;  %v3620_v22 = vor.u32 %v4793_v15, %v3619_v14 }
  0x68   : > { %638 = vmatpush.bf16.msra.mxu3 %v3368_v37  ;;  %600 = vmatmul.bf16.vlgmr.msra.gmra.mxu0 %v392_v42  ;;  %v4755_v20 = vld [vmem:[#allocation8 + $0x64] sm:$0xf]  ;;  %v3477_v21 = vld [vmem:[#allocation8 + $0x70] sm:$0xf0]  ;;  %v3476_v23 = vor.u32 %v4757_v17, %v3475_v13  ;;  %v3624_v24 = vor.u32 %v4791_v18, %v3621_v19  ;;  %v3459_v25 = vld [vmem:[#allocation8 + $0x40] sm:$0xf] }
  0x69   : > { %1042 = vmatpush.bf16.msrb.mxu0 %v3540_v38  ;;  %613 = vmatmul.bf16.vlgmr.msra.gmra.mxu1 %v393_v47  ;;  %v3603_v26 = vld [vmem:[#allocation8 + $0x160] sm:$0xf]  ;;  %v4789_v27 = vld [vmem:[#allocation8 + $0x16c] sm:$0xf0]  ;;  %v3480_v28 = vor.u32 %v4755_v20, %v3477_v21  ;;  %v4787_v30 = vld [vmem:[#allocation8 + $0x164] sm:$0xf] }
  0x6a   : > { %626 = vmatmul.bf16.vlgmr.msra.gmra.mxu2 %v392_v42  ;;  %1055 = vmatpush.bf16.msrb.mxu1 %v3668_v50  ;;  %v4753_v29 = vld [vmem:[#allocation8 + $0x4c] sm:$0xf0]  ;;  %v3605_v31 = vld [vmem:[#allocation8 + $0x170] sm:$0xf0]  ;;  %v4751_v32 = vld [vmem:[#allocation8 + $0x44] sm:$0xf]  ;;  %v3604_v34 = vor.u32 %v4789_v27, %v3603_v26 }
  0x6b   : > { %1068 = vmatpush.bf16.msrb.mxu2 %v3544_v43  ;;  %639 = vmatmul.bf16.vlgmr.msra.gmra.mxu3 %v393_v47  ;;  %v3461_v33 = vld [vmem:[#allocation8 + $0x50] sm:$0xf0]  ;;  %v3460_v35 = vor.u32 %v4753_v29, %v3459_v25  ;;  %v3608_v36 = vor.u32 %v4787_v30, %v3605_v31  ;;  %v3443_v37 = vld [vmem:[#allocation8 + $0x20] sm:$0xf]  ;;  %v4785_v39 = vld [vmem:[#allocation8 + $0x14c] sm:$0xf0] }
  0x6c   : > { %1081 = vmatpush.bf16.msrb.mxu3 %v3672_v52  ;;  %v3587_v38 = vld [vmem:[#allocation8 + $0x140] sm:$0xf]  ;;  %v3464_v40 = vor.u32 %v4751_v32, %v3461_v33  ;;  %v4749_v41 = vld [vmem:[#allocation8 + $0x2c] sm:$0xf0]  ;;  %v4783_v42 = vld [vmem:[#allocation8 + $0x144] sm:$0xf] }
  0x6d   : > { %1043 = vmatpush.bf16.msrb.mxu0 %v3524_v51  ;;  %v3589_v43 = vld [vmem:[#allocation8 + $0x150] sm:$0xf0]  ;;  %v4747_v44 = vld [vmem:[#allocation8 + $0x24] sm:$0xf]  ;;  %v3588_v46 = vor.u32 %v4785_v39, %v3587_v38  ;;  %v3427_v47 = vld [vmem:[#allocation8] sm:$0xf]  ;;  %v3444_v48 = vor.u32 %v4749_v41, %v3443_v37 }
  0x6e   : > { %1056 = vmatpush.bf16.msrb.mxu1 %v3652_v62  ;;  %v3445_v45 = vld [vmem:[#allocation8 + $0x30] sm:$0xf0]  ;;  %v3592_v49 = vor.u32 %v4783_v42, %v3589_v43  ;;  %v4745_v50 = vld [vmem:[#allocation8 + $0xc] sm:$0xf0]  ;;  %v3571_v51 = vld [vmem:[#allocation8 + $0x120] sm:$0xf] }
  0x6f   : > { %1069 = vmatpush.bf16.msrb.mxu2 %v3528_v56  ;;  %v4781_v52 = vld [vmem:[#allocation8 + $0x12c] sm:$0xf0]  ;;  %v3448_v53 = vor.u32 %v4747_v44, %v3445_v45  ;;  %v4743_v54 = vld [vmem:[#allocation8 + $0x4] sm:$0xf]  ;;  %v3573_v56 = vld [vmem:[#allocation8 + $0x130] sm:$0xf0] }
  0x70   : > { %1082 = vmatpush.bf16.msrb.mxu3 %v3656_v0  ;;  %v4779_v55 = vld [vmem:[#allocation8 + $0x124] sm:$0xf]  ;;  %v3429_v57 = vld [vmem:[#allocation8 + $0x10] sm:$0xf0]  ;;  %v3547_v58 = vld [vmem:[#allocation8 + $0xe8] sm:$0xf]  ;;  %v3572_v62 = vor.u32 %v4781_v52, %v3571_v51 }
  0x71   : > { %1044 = vmatpush.bf16.msrb.mxu0 %v3508_v63  ;;  %v4774_v59 = vld [vmem:[#allocation8 + $0xf4] sm:$0xf0]  ;;  %v4772_v60 = vld [vmem:[#allocation8 + $0xec] sm:$0xf]  ;;  %v3549_v61 = vld [vmem:[#allocation8 + $0xf8] sm:$0xf0]  ;;  %v3428_v63 = vor.u32 %v4745_v50, %v3427_v47  ;;  %v3576_v0 = vor.u32 %v4779_v55, %v3573_v56  ;;  %v3432_v3 = vor.u32 %v4743_v54, %v3429_v57 }
  0x72   : > { %1057 = vmatpush.bf16.msrb.mxu1 %v3636_v10  ;;  %v3555_v1 = vld [vmem:[#allocation8 + $0x100] sm:$0xf]  ;;  %v4777_v2 = vld [vmem:[#allocation8 + $0x10c] sm:$0xf0]  ;;  %v4775_v5 = vld [vmem:[#allocation8 + $0x104] sm:$0xf]  ;;  %v3552_v7 = vor.u32 %v4772_v60, %v3549_v61 }
  0x73   : > { %1070 = vmatpush.bf16.msrb.mxu2 %v3512_v4  ;;  %v3548_v4 = vor.u32 %v4774_v59, %v3547_v58  ;;  %v3557_v6 = vld [vmem:[#allocation8 + $0x110] sm:$0xf0]  ;;  %v3531_v8 = vld [vmem:[#allocation8 + $0xc8] sm:$0xf]  ;;  %v4770_v9 = vld [vmem:[#allocation8 + $0xd4] sm:$0xf0] }
  0x74   : > { %1083 = vmatpush.bf16.msrb.mxu3 %v3640_v12  ;;  %v4768_v10 = vld [vmem:[#allocation8 + $0xcc] sm:$0xf]  ;;  %v3556_v12 = vor.u32 %v4777_v2, %v3555_v1  ;;  %v3560_v13 = vor.u32 %v4775_v5, %v3557_v6  ;;  %v3532_v14 = vor.u32 %v4770_v9, %v3531_v8  ;;  %v4806_v17 = vld [vmem:[#allocation8 + $0x1f4] sm:$0xf0]  ;;  %v3677_v20 = vld [vmem:[#allocation8 + $0x1f8] sm:$0xf0] }
  0x75   : > { %1045 = vmatpush.bf16.msrb.mxu0 %v3492_v11  ;;  %v3533_v11 = vld [vmem:[#allocation8 + $0xd8] sm:$0xf0]  ;;  %v4804_v18 = vld [vmem:[#allocation8 + $0x1ec] sm:$0xf]  ;;  %v4802_v29 = vld [vmem:[#allocation8 + $0x1d4] sm:$0xf0] }
  0x76   : > { %1058 = vmatpush.bf16.msrb.mxu1 %v3620_v22  ;;  %v3536_v15 = vor.u32 %v4768_v10, %v3533_v11  ;;  %v3680_v21 = vor.u32 %v4804_v18, %v3677_v20  ;;  %v3515_v22 = vld [vmem:[#allocation8 + $0xa8] sm:$0xf]  ;;  %v3517_v26 = vld [vmem:[#allocation8 + $0xb8] sm:$0xf0]  ;;  %v4800_v30 = vld [vmem:[#allocation8 + $0x1cc] sm:$0xf] }
  0x77   : > { %1071 = vmatpush.bf16.msrb.mxu2 %v3496_v16  ;;  %v3675_v16 = vld [vmem:[#allocation8 + $0x1e8] sm:$0xf]  ;;  %v3661_v32 = vld [vmem:[#allocation8 + $0x1d8] sm:$0xf0]  ;;  %v4798_v41 = vld [vmem:[#allocation8 + $0x1b4] sm:$0xf0] }
  0x78   : > { %1084 = vmatpush.bf16.msrb.mxu3 %v3624_v24  ;;  %v3676_v19 = vor.u32 %v4806_v17, %v3675_v16  ;;  %v4764_v24 = vld [vmem:[#allocation8 + $0xac] sm:$0xf]  ;;  %v3664_v33 = vor.u32 %v4800_v30, %v3661_v32  ;;  %v3501_v38 = vld [vmem:[#allocation8 + $0x98] sm:$0xf0]  ;;  %v4758_v47 = vld [vmem:[#allocation8 + $0x74] sm:$0xf0] }
  0x79   : > { %1046 = vmatpush.bf16.msrb.mxu0 %v3476_v23  ;;  %v4766_v23 = vld [vmem:[#allocation8 + $0xb4] sm:$0xf0]  ;;  %v3520_v27 = vor.u32 %v4764_v24, %v3517_v26  ;;  %v4796_v43 = vld [vmem:[#allocation8 + $0x1ac] sm:$0xf]  ;;  %v3645_v44 = vld [vmem:[#allocation8 + $0x1b8] sm:$0xf0] }
  0x7a   : > { %1059 = vmatpush.bf16.msrb.mxu1 %v3604_v34  ;;  %v3516_v25 = vor.u32 %v4766_v23, %v3515_v22  ;;  %v3499_v34 = vld [vmem:[#allocation8 + $0x88] sm:$0xf]  ;;  %v3648_v45 = vor.u32 %v4796_v43, %v3645_v44  ;;  %v3485_v50 = vld [vmem:[#allocation8 + $0x78] sm:$0xf0]  ;;  %v4792_v54 = vld [vmem:[#allocation8 + $0x18c] sm:$0xf] }
  0x7b   : > { %1072 = vmatpush.bf16.msrb.mxu2 %v3480_v28  ;;  %v3659_v28 = vld [vmem:[#allocation8 + $0x1c8] sm:$0xf]  ;;  %v3629_v56 = vld [vmem:[#allocation8 + $0x198] sm:$0xf0]  ;;  %v4754_v59 = vld [vmem:[#allocation8 + $0x54] sm:$0xf0] }
  0x7c   : > { %1085 = vmatpush.bf16.msrb.mxu3 %v3608_v36  ;;  %v3660_v31 = vor.u32 %v4802_v29, %v3659_v28  ;;  %v4760_v36 = vld [vmem:[#allocation8 + $0x8c] sm:$0xf]  ;;  %v3627_v52 = vld [vmem:[#allocation8 + $0x188] sm:$0xf]  ;;  %v3632_v57 = vor.u32 %v4792_v54, %v3629_v56  ;;  %v4790_v1 = vld [vmem:[#allocation8 + $0x174] sm:$0xf0] }
  0x7d   : > { %1047 = vmatpush.bf16.msrb.mxu0 %v3460_v35  ;;  %v4762_v35 = vld [vmem:[#allocation8 + $0x94] sm:$0xf0]  ;;  %v3504_v39 = vor.u32 %v4760_v36, %v3501_v38  ;;  %v3467_v58 = vld [vmem:[#allocation8 + $0x48] sm:$0xf]  ;;  %v4752_v60 = vld [vmem:[#allocation8 + $0x4c] sm:$0xf] }
  0x7e   : > { %1060 = vmatpush.bf16.msrb.mxu1 %v3588_v46  ;;  %v3500_v37 = vor.u32 %v4762_v35, %v3499_v34  ;;  %v3483_v46 = vld [vmem:[#allocation8 + $0x68] sm:$0xf]  ;;  %v3468_v61 = vor.u32 %v4754_v59, %v3467_v58  ;;  %v4788_v2 = vld [vmem:[#allocation8 + $0x16c] sm:$0xf]  ;;  %v4750_v6 = vld [vmem:[#allocation8 + $0x34] sm:$0xf0] }
  0x7f   : > { %1073 = vmatpush.bf16.msrb.mxu2 %v3464_v40  ;;  %v3643_v40 = vld [vmem:[#allocation8 + $0x1a8] sm:$0xf]  ;;  %v4748_v9 = vld [vmem:[#allocation8 + $0x2c] sm:$0xf]  ;;  %v3453_v10 = vld [vmem:[#allocation8 + $0x38] sm:$0xf0] }
  0x80   : > { %1086 = vmatpush.bf16.msrb.mxu3 %v3592_v49  ;;  %v3644_v42 = vor.u32 %v4798_v41, %v3643_v40  ;;  %v3484_v49 = vor.u32 %v4758_v47, %v3483_v46  ;;  %v3451_v5 = vld [vmem:[#allocation8 + $0x28] sm:$0xf]  ;;  %v4744_v20 = vld [vmem:[#allocation8 + $0xc] sm:$0xf]  ;;  %v3437_v22 = vld [vmem:[#allocation8 + $0x18] sm:$0xf0] }
  0x81   : > { %1048 = vmatpush.bf16.msrb.mxu0 %v3444_v48  ;;  %v4756_v48 = vld [vmem:[#allocation8 + $0x6c] sm:$0xf]  ;;  %v3452_v8 = vor.u32 %v4750_v6, %v3451_v5  ;;  %v3595_v11 = vld [vmem:[#allocation8 + $0x148] sm:$0xf]  ;;  %v4782_v24 = vld [vmem:[#allocation8 + $0x134] sm:$0xf0] }
  0x82   : > { %1061 = vmatpush.bf16.msrb.mxu1 %v3572_v62  ;;  %v3488_v51 = vor.u32 %v4756_v48, %v3485_v50  ;;  %v3469_v62 = vld [vmem:[#allocation8 + $0x58] sm:$0xf0]  ;;  %v3435_v18 = vld [vmem:[#allocation8 + $0x8] sm:$0xf]  ;;  %v4780_v26 = vld [vmem:[#allocation8 + $0x12c] sm:$0xf] }
  0x83   : > { %1074 = vmatpush.bf16.msrb.mxu2 %v3448_v53  ;;  %v4794_v53 = vld [vmem:[#allocation8 + $0x194] sm:$0xf0]  ;;  %v3579_v23 = vld [vmem:[#allocation8 + $0x128] sm:$0xf]  ;;  %v4776_v32 = vld [vmem:[#allocation8 + $0x10c] sm:$0xf] }
  0x84   : > { %1087 = vmatpush.bf16.msrb.mxu3 %v3576_v0  ;;  %v3628_v55 = vor.u32 %v4794_v53, %v3627_v52  ;;  %v3611_v0 = vld [vmem:[#allocation8 + $0x168] sm:$0xf]  ;;  %v3580_v28 = vor.u32 %v4782_v24, %v3579_v23  ;;  %v3565_v35 = vld [vmem:[#allocation8 + $0x118] sm:$0xf0]  ;;  %v4867_v43 = vld [vmem:[#allocation11 + $0x1dc] sm:$0xf0] }
  0x85   : > { %1049 = vmatpush.bf16.msrb.mxu0 %v3428_v63  ;;  %v3472_v63 = vor.u32 %v4752_v60, %v3469_v62  ;;  %v3563_v30 = vld [vmem:[#allocation8 + $0x108] sm:$0xf]  ;;  %v3568_v36 = vor.u32 %v4776_v32, %v3565_v35  ;;  %v4419_v46 = vld [vmem:[#allocation11 + $0x5c0] sm:$0xf]  ;;  %s5738_s2 = scalar_lea.vmem [#allocation14], %s3296_s1  ;;  %s3148_s11 = sshll.u32 %s3144_s30, 4  ;;  %s3149_s11 = int_to_ptr.hbm [resolvable:$true] %s3148_s11 }
  0x86   : > { %1062 = vmatpush.bf16.msrb.mxu1 %v3556_v12  ;;  %v3456_v12 = vor.u32 %v4748_v9, %v3453_v10  ;;  %v4995_v48 = vld [vmem:[#allocation11 + $0x5dc] sm:$0xf0]  ;;  %s3146_s13 = sshll.u32 %s5738_s2, 4  ;;  %s3133_s22 = scalar_lea.sflag [#allocation4], %s5647_s18  ;;  %s3147_s13 = int_to_ptr.vmem [resolvable:$true] %s3146_s13 }
  0x87   : > { %1075 = vmatpush.bf16.msrb.mxu2 %v3432_v3  ;;  %v3612_v3 = vor.u32 %v4790_v1, %v3611_v0  ;;  %v4859_v52 = vld [vmem:[#allocation11 + $0x19c] sm:$0xf0]  ;;  %v4420_v53 = vor.u32 %v4995_v48, %v4419_v46  ;;  %s5401_s23 = sshra.s32 %s3149_s11, 4  ;;  %s5407_s29 = scalar_lea.hbm %s5811_s7, 128  ;;  %s5402_s23 = int_to_ptr.hbm [resolvable:$true] %s5401_s23 }
  0x88   : > { %1088 = vmatpush.bf16.msrb.mxu3 %v3560_v13  ;;  %v4786_v13 = vld [vmem:[#allocation8 + $0x154] sm:$0xf0]  ;;  %v4387_v54 = vld [vmem:[#allocation11 + $0x580] sm:$0xf]  ;;  %s5403_s8 = scalar_lea.hbm %s5402_s23, 64  ;;  %p5408_p12 = scmp.lt.s32.totalorder %s5402_s23, %s5811_s7 }
  0x89   : > { %1094 = vmatpush.bf16.msra.mxu0 %v3548_v4  ;;  %v3613_v4 = vld [vmem:[#allocation8 + $0x178] sm:$0xf0]  ;;  %v3596_v16 = vor.u32 %v4786_v13, %v3595_v11  ;;  %v4987_v58 = vld [vmem:[#allocation11 + $0x59c] sm:$0xf0]  ;;  %p5404_p1 = scmp.ne.s32.totalorder %s5402_s23, %s5403_s8  ;;  %p5409_p7 = scmp.lt.s32.totalorder %s5407_s29, %s5403_s8 }
  0x8a   : > { %1107 = vmatpush.bf16.msra.mxu1 %v3676_v19  ;;  %v4746_v19 = vld [vmem:[#allocation8 + $0x14] sm:$0xf0]  ;;  %v4163_v60 = vld [vmem:[#allocation11 + $0x3c0] sm:$0xf]  ;;  %v4388_v1 = vor.u32 %v4987_v58, %v4387_v54 }
  0x8b   : > { %1120 = vmatpush.bf16.msra.mxu2 %v3552_v7  ;;  %v3616_v7 = vor.u32 %v4788_v2, %v3613_v4  ;;  %v3843_v0 = vld [vmem:[#allocation11 + $0x140] sm:$0xf]  ;;  %p5405_p3 = pnand %p5404_p1, %p5616_p4  ;;  %p5410_p8 = por %p5409_p7, %p5408_p12 }
  0x8c   : > { %1133 = vmatpush.bf16.msra.mxu3 %v3680_v21  ;;  %v3436_v21 = vor.u32 %v4746_v19, %v3435_v18  ;;  %v4675_v2 = vld [vmem:[#allocation11 + $0x7c0] sm:$0xf] }
  0x8d   : > { %1095 = vmatpush.bf16.msra.mxu0 %v3532_v14  ;;  %v4784_v14 = vld [vmem:[#allocation8 + $0x14c] sm:$0xf]  ;;  %v4851_v4 = vld [vmem:[#allocation11 + $0x15c] sm:$0xf0]  ;;  %p5406_p5 = pneg %p5405_p3 }
  0x8e   : > { %1108 = vmatpush.bf16.msra.mxu1 %v3660_v31  ;;  %v4778_v31 = vld [vmem:[#allocation8 + $0x114] sm:$0xf0]  ;;  %v4355_v5 = vld [vmem:[#allocation11 + $0x540] sm:$0xf]  ;;  %v3844_v13 = vor.u32 %v4851_v4, %v3843_v0  ;;  %v3909_v4 = vld [vmem:[#allocation11 + $0x1e0] sm:$0xf0] }
  0x8f   : > { %1121 = vmatpush.bf16.msra.mxu2 %v3536_v15  ;;  %v3597_v15 = vld [vmem:[#allocation8 + $0x158] sm:$0xf0]  ;;  %v3564_v34 = vor.u32 %v4778_v31, %v3563_v30  ;;  %v4979_v6 = vld [vmem:[#allocation11 + $0x55c] sm:$0xf0]  ;;  %p5411_p9 = pnand %p5410_p8, %p5406_p5 }
  0x90   : > { %1134 = vmatpush.bf16.msra.mxu3 %v3664_v33  ;;  %v3600_v17 = vor.u32 %v4784_v14, %v3597_v15  ;;  %v426_v33 = vld [vmem:[#allocation7] sm:$0x3]  ;;  %v4131_v9 = vld [vmem:[#allocation11 + $0x380] sm:$0xf]  ;;  %v4356_v15 = vor.u32 %v4979_v6, %v4355_v5 }
  0x91   : > { %1096 = vmatpush.bf16.msra.mxu0 %v3516_v25  ;;  %v3440_v25 = vor.u32 %v4744_v20, %v3437_v22  ;;  %v429_v44 = vperm.slane %v426_v33, 1  ;;  %v4923_v10 = vld [vmem:[#allocation11 + $0x39c] sm:$0xf0] }
  0x92   : > { %1109 = vmatpush.bf16.msra.mxu1 %v3644_v42  ;;  %v3907_v42 = vld [vmem:[#allocation11 + $0x1c0] sm:$0xf]  ;;  %v4132_v23 = vor.u32 %v4923_v10, %v4131_v9 }
  0x93   : > { %1122 = vmatpush.bf16.msra.mxu2 %v3520_v27  ;;  %v3581_v27 = vld [vmem:[#allocation8 + $0x138] sm:$0xf0]  ;;  %v3908_v47 = vor.u32 %v4867_v43, %v3907_v42  ;;  %v3811_v14 = vld [vmem:[#allocation11 + $0x100] sm:$0xf] }
  0x94   : > { %1135 = vmatpush.bf16.msra.mxu3 %v3648_v45  ;;  %v3584_v29 = vor.u32 %v4780_v26, %v3581_v27  ;;  %v4843_v19 = vld [vmem:[#allocation11 + $0x11c] sm:$0xf0] }
  0x95   : > { %1097 = vmatpush.bf16.msra.mxu0 %v3500_v37  ;;  %v428_v37 = vperm.slane %v426_v33, 0  ;;  %v4323_v20 = vld [vmem:[#allocation11 + $0x500] sm:$0xf] }
  0x96   : > { %1110 = vmatpush.bf16.msra.mxu1 %v3628_v55  ;;  %v4099_v26 = vld [vmem:[#allocation11 + $0x340] sm:$0xf] }
  0x97   : > { %1123 = vmatpush.bf16.msra.mxu2 %v3504_v39  ;;  %v4915_v27 = vld [vmem:[#allocation11 + $0x35c] sm:$0xf0] }
  0x98   : > { %1136 = vmatpush.bf16.msra.mxu3 %v3632_v57  ;;  %v4835_v30 = vld [vmem:[#allocation11 + $0xdc] sm:$0xf0]  ;;  %v4100_v35 = vor.u32 %v4915_v27, %v4099_v26 }
  0x99   : > { %1098 = vmatpush.bf16.msra.mxu0 %v3484_v49  ;;  %v4611_v31 = vld [vmem:[#allocation11 + $0x740] sm:$0xf] }
  0x9a   : > { %1111 = vmatpush.bf16.msra.mxu1 %v3612_v3  ;;  %v5059_v3 = vld [vmem:[#allocation11 + $0x7dc] sm:$0xf0] }
  0x9b   : > { %1124 = vmatpush.bf16.msra.mxu2 %v3488_v51  ;;  %v3875_v51 = vld [vmem:[#allocation11 + $0x180] sm:$0xf]  ;;  %v4676_v11 = vor.u32 %v5059_v3, %v4675_v2 }
  0x9c   : > { %1137 = vmatpush.bf16.msra.mxu3 %v3616_v7  ;;  %v5043_v32 = vld [vmem:[#allocation11 + $0x75c] sm:$0xf0] }
  0x9d   : > { %1099 = vmatpush.bf16.msra.mxu0 %v3468_v61  ;;  %v4931_v61 = vld [vmem:[#allocation11 + $0x3dc] sm:$0xf0] }
  0x9e   : > { %1112 = vmatpush.bf16.msra.mxu1 %v3596_v16  ;;  %v4643_v16 = vld [vmem:[#allocation11 + $0x780] sm:$0xf] }
  0x9f   : > { %1125 = vmatpush.bf16.msra.mxu2 %v3472_v63  ;;  %v3876_v63 = vor.u32 %v4859_v52, %v3875_v51  ;;  %v4291_v33 = vld [vmem:[#allocation11 + $0x4c0] sm:$0xf] }
  0xa0   : > { %1138 = vmatpush.bf16.msra.mxu3 %v3600_v17  ;;  %v5051_v17 = vld [vmem:[#allocation11 + $0x79c] sm:$0xf0] }
  0xa1   : > { %1100 = vmatpush.bf16.msra.mxu0 %v3452_v8  ;;  %v4164_v8 = vor.u32 %v4931_v61, %v4163_v60  ;;  %v4644_v24 = vor.u32 %v5051_v17, %v4643_v16  ;;  %v4579_v43 = vld [vmem:[#allocation11 + $0x700] sm:$0xf]  ;;  %v4855_v16 = vld [vmem:[#allocation11 + $0x184] sm:$0xf] }
  0xa2   : > { %1113 = vmatpush.bf16.msra.mxu1 %v3580_v28  ;;  %v4955_v46 = vld [vmem:[#allocation11 + $0x49c] sm:$0xf0]  ;;  %v3877_v17 = vld [vmem:[#allocation11 + $0x1a0] sm:$0xf0] }
  0xa3   : > { %1126 = vmatpush.bf16.msra.mxu2 %v3456_v12  ;;  %v4899_v51 = vld [vmem:[#allocation11 + $0x2dc] sm:$0xf0] }
  0xa4   : > { %1139 = vmatpush.bf16.msra.mxu3 %v3584_v29  ;;  %v3779_v29 = vld [vmem:[#allocation11 + $0xc0] sm:$0xf] }
  0xa5   : > { %1101 = vmatpush.bf16.msra.mxu0 %v3436_v21  ;;  %v4971_v21 = vld [vmem:[#allocation11 + $0x51c] sm:$0xf0] }
  0xa6   : > { %1114 = vmatpush.bf16.msra.mxu1 %v3564_v34  ;;  %v4324_v28 = vor.u32 %v4971_v21, %v4323_v20  ;;  %v4963_v34 = vld [vmem:[#allocation11 + $0x4dc] sm:$0xf0] }
  0xa7   : > { %1127 = vmatpush.bf16.msra.mxu2 %v3440_v25  ;;  %v3812_v25 = vor.u32 %v4843_v19, %v3811_v14  ;;  %v4292_v42 = vor.u32 %v4963_v34, %v4291_v33  ;;  %v3715_v52 = vld [vmem:[#allocation11 + $0x40] sm:$0xf]  ;;  %v3880_v19 = vor.u32 %v4855_v16, %v3877_v17  ;;  %v4967_v17 = vld [vmem:[#allocation11 + $0x504] sm:$0xf] }
  0xa8   : > { %1140 = vmatpush.bf16.msra.mxu3 %v3568_v36  ;;  %v3780_v36 = vor.u32 %v4835_v30, %v3779_v29  ;;  %v4227_v58 = vld [vmem:[#allocation11 + $0x440] sm:$0xf]  ;;  %v4919_v29 = vld [vmem:[#allocation11 + $0x384] sm:$0xf] }
  0xa9   : > { %v4003_v61 = vld [vmem:[#allocation11 + $0x280] sm:$0xf]  ;;  %v4133_v30 = vld [vmem:[#allocation11 + $0x3a0] sm:$0xf0] }
  0xaa   : > { %v4811_v0 = vld [vmem:[#allocation11 + $0x1c] sm:$0xf0]  ;;  %v4136_v33 = vor.u32 %v4919_v29, %v4133_v30  ;;  %v3941_v29 = vld [vmem:[#allocation11 + $0x220] sm:$0xf0] }
  0xab   : > { %v4515_v5 = vld [vmem:[#allocation11 + $0x680] sm:$0xf] }
  0xac   : > { %v5019_v6 = vld [vmem:[#allocation11 + $0x69c] sm:$0xf0] }
  0xad   : > { %v4883_v14 = vld [vmem:[#allocation11 + $0x25c] sm:$0xf0] }
  0xae   : > { %v3939_v20 = vld [vmem:[#allocation11 + $0x200] sm:$0xf] }
  0xaf   : > { %v4875_v21 = vld [vmem:[#allocation11 + $0x21c] sm:$0xf0] }
  0xb0   : > { %v3940_v26 = vor.u32 %v4875_v21, %v3939_v20  ;;  %v3973_v20 = vld [vmem:[#allocation11 + $0x260] sm:$0xf0] }
  0xe5   : > { %v601_v38 = vpop.f32.mrf.mxu0 }
  0xe6   : > { %v602_v39 = vadd.f32 %v601_v38, %v428_v37  ;;  %v614_v40 = vpop.f32.mrf.mxu1  ;;  %v4067_v37 = vld [vmem:[#allocation11 + $0x300] sm:$0xf] }
  0xe7   : > { %v4907_v38 = vld [vmem:[#allocation11 + $0x31c] sm:$0xf0] }
  0xe8   : > { %v615_v41 = vadd.f32 %v614_v40, %v602_v39  ;;  %v3747_v39 = vld [vmem:[#allocation11 + $0x80] sm:$0xf] }
  0xe9   : > { %v4827_v40 = vld [vmem:[#allocation11 + $0x9c] sm:$0xf0] }
  0xea   : > { %v644_v45 = vmax.f32 %v615_v41, 0.0  ;;  %v4612_v41 = vor.u32 %v5043_v32, %v4611_v31  ;;  %v3748_v48 = vor.u32 %v4827_v40, %v3747_v39  ;;  %v4839_v31 = vld [vmem:[#allocation11 + $0x104] sm:$0xf] }
  0xeb   : > { %v3813_v32 = vld [vmem:[#allocation11 + $0x120] sm:$0xf0] }
  0xec   : > { %v5671_v49 = vpack.c.bf16 %v644_v45, %v644_v45  ;;  %v4259_v45 = vld [vmem:[#allocation11 + $0x480] sm:$0xf]  ;;  %v3816_v34 = vor.u32 %v4839_v31, %v3813_v32  ;;  %v3781_v39 = vld [vmem:[#allocation11 + $0xe0] sm:$0xf0] }
  0xed   : > { %v627_v50 = vpop.f32.mrf.mxu2  ;;  %v603_v57 = vpop.f32.mrf.mxu0  ;;  %v4991_v40 = vld [vmem:[#allocation11 + $0x5c4] sm:$0xf] }
  0xee   : > { %v628_v55 = vadd.f32 %v627_v50, %v429_v44  ;;  %v640_v56 = vpop.f32.mrf.mxu3  ;;  %v616_v59 = vpop.f32.mrf.mxu1  ;;  %1050 = vmatmul.bf16.vlgmr.msrb.gmra.mxu0 %v5671_v49  ;;  %1076 = vmatmul.bf16.vlgmr.msrb.gmra.mxu2 %v5671_v49  ;;  %v5035_v44 = vld [vmem:[#allocation11 + $0x71c] sm:$0xf0]  ;;  %v5031_v31 = vld [vmem:[#allocation11 + $0x704] sm:$0xf] }
  0xef   : > { %2708 = vmatpush.bf16.msrb.mxu0 %v3908_v47  ;;  %2734 = vmatpush.bf16.msrb.mxu2 %v4420_v53  ;;  %v4068_v47 = vor.u32 %v4907_v38, %v4067_v37  ;;  %v4035_v50 = vld [vmem:[#allocation11 + $0x2c0] sm:$0xf]  ;;  %v4580_v54 = vor.u32 %v5035_v44, %v4579_v43  ;;  %v4831_v38 = vld [vmem:[#allocation11 + $0xc4] sm:$0xf] }
  0xf0   : > { %v641_v62 = vadd.f32 %v640_v56, %v628_v55  ;;  %v4819_v53 = vld [vmem:[#allocation11 + $0x5c] sm:$0xf0]  ;;  %v4260_v55 = vor.u32 %v4955_v46, %v4259_v45  ;;  %v4036_v60 = vor.u32 %v4899_v51, %v4035_v50  ;;  %v4823_v50 = vld [vmem:[#allocation11 + $0x84] sm:$0xf] }
  0xf1   : > { %v4547_v56 = vld [vmem:[#allocation11 + $0x6c0] sm:$0xf]  ;;  %v4581_v32 = vld [vmem:[#allocation11 + $0x720] sm:$0xf0] }
  0xf2   : > { %v645_v7 = vmax.f32 %v641_v62, 0.0  ;;  %v5027_v57 = vld [vmem:[#allocation11 + $0x6dc] sm:$0xf0] }
  0xf3   : > { %2709 = vmatpush.bf16.msrb.mxu0 %v3876_v63  ;;  %2735 = vmatpush.bf16.msrb.mxu2 %v4388_v1  ;;  %v4947_v59 = vld [vmem:[#allocation11 + $0x45c] sm:$0xf0]  ;;  %v4863_v1 = vld [vmem:[#allocation11 + $0x1c4] sm:$0xf]  ;;  %v4548_v2 = vor.u32 %v5027_v57, %v4547_v56 }
  0xf4   : > { %v5675_v12 = vpack.c.bf16 %v645_v7, %v645_v7  ;;  %v4891_v62 = vld [vmem:[#allocation11 + $0x29c] sm:$0xf0]  ;;  %v4228_v3 = vor.u32 %v4947_v59, %v4227_v58 }
  0xf5   : > { %v629_v18 = vpop.f32.mrf.mxu2  ;;  %v3683_v63 = vld [vmem:[#allocation11] sm:$0xf]  ;;  %v4004_v9 = vor.u32 %v4891_v62, %v4003_v61  ;;  %v5055_v61 = vld [vmem:[#allocation11 + $0x7c4] sm:$0xf] }
  0xf6   : > { %v642_v22 = vpop.f32.mrf.mxu3  ;;  %1063 = vmatmul.bf16.vlgmr.msrb.gmra.mxu1 %v5675_v12  ;;  %1089 = vmatmul.bf16.vlgmr.msrb.gmra.mxu3 %v5675_v12  ;;  %v4195_v7 = vld [vmem:[#allocation11 + $0x400] sm:$0xf]  ;;  %v3684_v10 = vor.u32 %v4811_v0, %v3683_v63  ;;  %v4677_v63 = vld [vmem:[#allocation11 + $0x7e0] sm:$0xf0] }
  0xf7   : > { %2721 = vmatpush.bf16.msrb.mxu1 %v4164_v8  ;;  %2747 = vmatpush.bf16.msrb.mxu3 %v4676_v11  ;;  %v4939_v8 = vld [vmem:[#allocation11 + $0x41c] sm:$0xf0]  ;;  %v3912_v11 = vor.u32 %v4863_v1, %v3909_v4  ;;  %v4927_v22 = vld [vmem:[#allocation11 + $0x3c4] sm:$0xf]  ;;  %v4680_v0 = vor.u32 %v5055_v61, %v4677_v63 }
  0xf8   : > { %2710 = vmatpush.bf16.msrb.mxu0 %v3844_v13  ;;  %2736 = vmatpush.bf16.msrb.mxu2 %v4356_v15  ;;  %v3971_v13 = vld [vmem:[#allocation11 + $0x240] sm:$0xf]  ;;  %v4516_v15 = vor.u32 %v5019_v6, %v4515_v5  ;;  %v4196_v18 = vor.u32 %v4939_v8, %v4195_v7  ;;  %v4815_v1 = vld [vmem:[#allocation11 + $0x44] sm:$0xf] }
  0xf9   : > { %v4483_v43 = vld [vmem:[#allocation11 + $0x640] sm:$0xf]  ;;  %v4357_v5 = vld [vmem:[#allocation11 + $0x560] sm:$0xf0] }
  0xfa   : > { %v5011_v44 = vld [vmem:[#allocation11 + $0x65c] sm:$0xf0]  ;;  %v4887_v7 = vld [vmem:[#allocation11 + $0x284] sm:$0xf] }
  0xfb   : > { %2722 = vmatpush.bf16.msrb.mxu1 %v4132_v23  ;;  %2748 = vmatpush.bf16.msrb.mxu3 %v4644_v24  ;;  %v4165_v23 = vld [vmem:[#allocation11 + $0x3e0] sm:$0xf0]  ;;  %v4484_v46 = vor.u32 %v5011_v44, %v4483_v43  ;;  %v4451_v57 = vld [vmem:[#allocation11 + $0x600] sm:$0xf] }
  0xfc   : > { %2711 = vmatpush.bf16.msrb.mxu0 %v3812_v25  ;;  %2737 = vmatpush.bf16.msrb.mxu2 %v4324_v28  ;;  %v4847_v24 = vld [vmem:[#allocation11 + $0x144] sm:$0xf]  ;;  %v4168_v27 = vor.u32 %v4927_v22, %v4165_v23  ;;  %v5003_v58 = vld [vmem:[#allocation11 + $0x61c] sm:$0xf0] }
  0xfd   : > { %v3845_v25 = vld [vmem:[#allocation11 + $0x160] sm:$0xf0]  ;;  %v4452_v59 = vor.u32 %v5003_v58, %v4451_v57 }
  0xfe   : > { %1102 = vmatmul.bf16.vlgmr.msra.gmra.mxu0 %v5671_v49  ;;  %1128 = vmatmul.bf16.vlgmr.msra.gmra.mxu2 %v5671_v49  ;;  %v3716_v49 = vor.u32 %v4819_v53, %v3715_v52  ;;  %v3848_v28 = vor.u32 %v4847_v24, %v3845_v25  ;;  %v3749_v52 = vld [vmem:[#allocation11 + $0xa0] sm:$0xf0] }
  0xff   : > { %2723 = vmatpush.bf16.msrb.mxu1 %v4100_v35  ;;  %2749 = vmatpush.bf16.msrb.mxu3 %v4612_v41  ;;  %v4911_v35 = vld [vmem:[#allocation11 + $0x344] sm:$0xf]  ;;  %v3784_v41 = vor.u32 %v4831_v38, %v3781_v39 }
 0x100   : > { %2712 = vmatpush.bf16.msrb.mxu0 %v3780_v36  ;;  %2738 = vmatpush.bf16.msrb.mxu2 %v4292_v42  ;;  %v4101_v36 = vld [vmem:[#allocation11 + $0x360] sm:$0xf0] }
 0x101   : > { %v4104_v37 = vor.u32 %v4911_v35, %v4101_v36  ;;  %v4421_v42 = vld [vmem:[#allocation11 + $0x5e0] sm:$0xf0] }
 0x102   : > { %v4424_v45 = vor.u32 %v4991_v40, %v4421_v42  ;;  %v4983_v53 = vld [vmem:[#allocation11 + $0x584] sm:$0xf] }
 0x103   : > { %2724 = vmatpush.bf16.msrb.mxu1 %v4068_v47  ;;  %2750 = vmatpush.bf16.msrb.mxu3 %v4580_v54  ;;  %v4903_v47 = vld [vmem:[#allocation11 + $0x304] sm:$0xf] }
 0x104   : > { %2713 = vmatpush.bf16.msrb.mxu0 %v3748_v48  ;;  %2739 = vmatpush.bf16.msrb.mxu2 %v4260_v55  ;;  %v4069_v48 = vld [vmem:[#allocation11 + $0x320] sm:$0xf0]  ;;  %v3752_v55 = vor.u32 %v4823_v50, %v3749_v52  ;;  %v5683_v50 = vld [vmem:[#allocation10] sm:$0xf] }
 0x105   : > { %v4072_v51 = vor.u32 %v4903_v47, %v4069_v48  ;;  %v4389_v54 = vld [vmem:[#allocation11 + $0x5a0] sm:$0xf0] }
 0x106   : > { %1115 = vmatmul.bf16.vlgmr.msra.gmra.mxu1 %v5675_v12  ;;  %1141 = vmatmul.bf16.vlgmr.msra.gmra.mxu3 %v5675_v12  ;;  %v3972_v12 = vor.u32 %v4883_v14, %v3971_v13  ;;  %v4392_v56 = vor.u32 %v4983_v53, %v4389_v54  ;;  %v4005_v8 = vld [vmem:[#allocation11 + $0x2a0] sm:$0xf0]  ;;  %v714_v54 = vperm.slane %v5683_v50, 0 }
 0x107   : > { %2725 = vmatpush.bf16.msrb.mxu1 %v4036_v60  ;;  %2751 = vmatpush.bf16.msrb.mxu3 %v4548_v2  ;;  %v4895_v60 = vld [vmem:[#allocation11 + $0x2c4] sm:$0xf] }
 0x108   : > { %2714 = vmatpush.bf16.msrb.mxu0 %v3716_v49  ;;  %2740 = vmatpush.bf16.msrb.mxu2 %v4228_v3  ;;  %v4037_v49 = vld [vmem:[#allocation11 + $0x2e0] sm:$0xf0] }
 0x109   : > { %v4040_v62 = vor.u32 %v4895_v60, %v4037_v49  ;;  %v3717_v2 = vld [vmem:[#allocation11 + $0x60] sm:$0xf0]  ;;  %v715_v60 = vperm.slane %v5683_v50, 1 }
 0x10a   : > { %v4975_v3 = vld [vmem:[#allocation11 + $0x544] sm:$0xf]  ;;  %v3720_v4 = vor.u32 %v4815_v1, %v3717_v2  ;;  %v4868_v1 = vld [vmem:[#allocation11 + $0x1e4] sm:$0xf0] }
 0x10b   : > { %2726 = vmatpush.bf16.msrb.mxu1 %v4004_v9  ;;  %2752 = vmatpush.bf16.msrb.mxu3 %v4516_v15  ;;  %v4360_v6 = vor.u32 %v4975_v3, %v4357_v5  ;;  %v5047_v9 = vld [vmem:[#allocation11 + $0x784] sm:$0xf] }
 0x10c   : > { %2715 = vmatpush.bf16.msrb.mxu0 %v3684_v10  ;;  %2741 = vmatpush.bf16.msrb.mxu2 %v4196_v18  ;;  %v4008_v10 = vor.u32 %v4887_v7, %v4005_v8  ;;  %v4807_v14 = vld [vmem:[#allocation11 + $0x4] sm:$0xf]  ;;  %v4860_v7 = vld [vmem:[#allocation11 + $0x1a4] sm:$0xf0] }
 0x10d   : > { %v3685_v15 = vld [vmem:[#allocation11 + $0x20] sm:$0xf0] }
 0x10e   : > { %v3688_v16 = vor.u32 %v4807_v14, %v3685_v15  ;;  %v4325_v18 = vld [vmem:[#allocation11 + $0x520] sm:$0xf0] }
 0x10f   : > { %2727 = vmatpush.bf16.msrb.mxu1 %v3972_v12  ;;  %2753 = vmatpush.bf16.msrb.mxu3 %v4484_v46  ;;  %v4328_v12 = vor.u32 %v4967_v17, %v4325_v18  ;;  %v5039_v22 = vld [vmem:[#allocation11 + $0x744] sm:$0xf]  ;;  %v3851_v18 = vld [vmem:[#allocation11 + $0x148] sm:$0xf] }
 0x110   : > { %2760 = vmatpush.bf16.msra.mxu0 %v3912_v11  ;;  %2786 = vmatpush.bf16.msra.mxu2 %v4424_v45  ;;  %v4645_v11 = vld [vmem:[#allocation11 + $0x7a0] sm:$0xf0] }
 0x111   : > { %v4648_v13 = vor.u32 %v5047_v9, %v4645_v11  ;;  %v4613_v23 = vld [vmem:[#allocation11 + $0x760] sm:$0xf0]  ;;  %v4171_v11 = vld [vmem:[#allocation11 + $0x3c8] sm:$0xf] }
 0x112   : > { %v4616_v24 = vor.u32 %v5039_v22, %v4613_v23  ;;  %v4959_v25 = vld [vmem:[#allocation11 + $0x4c4] sm:$0xf]  ;;  %v4139_v22 = vld [vmem:[#allocation11 + $0x388] sm:$0xf] }
 0x113   : > { %2728 = vmatpush.bf16.msrb.mxu1 %v3940_v26  ;;  %2754 = vmatpush.bf16.msrb.mxu3 %v4452_v59  ;;  %v4293_v26 = vld [vmem:[#allocation11 + $0x4e0] sm:$0xf0]  ;;  %v4924_v23 = vld [vmem:[#allocation11 + $0x3a4] sm:$0xf0] }
 0x114   : > { %2761 = vmatpush.bf16.msra.mxu0 %v3880_v19  ;;  %2787 = vmatpush.bf16.msra.mxu2 %v4392_v56  ;;  %v4879_v19 = vld [vmem:[#allocation11 + $0x244] sm:$0xf] }
 0x115   : > { %v3976_v21 = vor.u32 %v4879_v19, %v3973_v20  ;;  %v4261_v35 = vld [vmem:[#allocation11 + $0x4a0] sm:$0xf0] }
 0x116   : > { %v4549_v38 = vld [vmem:[#allocation11 + $0x6e0] sm:$0xf0] }
 0x117   : > { %2773 = vmatpush.bf16.msra.mxu1 %v4168_v27  ;;  %2799 = vmatpush.bf16.msra.mxu3 %v4680_v0  ;;  %v4296_v27 = vor.u32 %v4959_v25, %v4293_v26  ;;  %v4943_v40 = vld [vmem:[#allocation11 + $0x444] sm:$0xf]  ;;  %v3915_v0 = vld [vmem:[#allocation11 + $0x1c8] sm:$0xf] }
 0x118   : > { %2762 = vmatpush.bf16.msra.mxu0 %v3848_v28  ;;  %2788 = vmatpush.bf16.msra.mxu2 %v4360_v6  ;;  %v4871_v28 = vld [vmem:[#allocation11 + $0x204] sm:$0xf]  ;;  %v3883_v6 = vld [vmem:[#allocation11 + $0x188] sm:$0xf] }
 0x119   : > { %v3944_v30 = vor.u32 %v4871_v28, %v3941_v29  ;;  %v5015_v43 = vld [vmem:[#allocation11 + $0x684] sm:$0xf]  ;;  %v3884_v15 = vor.u32 %v4860_v7, %v3883_v6  ;;  %v3819_v25 = vld [vmem:[#allocation11 + $0x108] sm:$0xf]  ;;  %v4140_v28 = vor.u32 %v4924_v23, %v4139_v22 }
 0x11a   : > { %v4517_v44 = vld [vmem:[#allocation11 + $0x6a0] sm:$0xf0]  ;;  %v4844_v26 = vld [vmem:[#allocation11 + $0x124] sm:$0xf0] }
 0x11b   : > { %2774 = vmatpush.bf16.msra.mxu1 %v4136_v33  ;;  %2800 = vmatpush.bf16.msra.mxu3 %v4648_v13  ;;  %v4584_v33 = vor.u32 %v5031_v31, %v4581_v32  ;;  %v4520_v45 = vor.u32 %v5015_v43, %v4517_v44  ;;  %v4935_v46 = vld [vmem:[#allocation11 + $0x404] sm:$0xf]  ;;  %v4932_v13 = vld [vmem:[#allocation11 + $0x3e4] sm:$0xf0] }
 0x11c   : > { %2763 = vmatpush.bf16.msra.mxu0 %v3816_v34  ;;  %2789 = vmatpush.bf16.msra.mxu2 %v4328_v12  ;;  %v4951_v34 = vld [vmem:[#allocation11 + $0x484] sm:$0xf]  ;;  %v4852_v12 = vld [vmem:[#allocation11 + $0x164] sm:$0xf0]  ;;  %v4172_v19 = vor.u32 %v4932_v13, %v4171_v11 }
 0x11d   : > { %v4264_v36 = vor.u32 %v4951_v34, %v4261_v35  ;;  %v4197_v47 = vld [vmem:[#allocation11 + $0x420] sm:$0xf0]  ;;  %v4107_v31 = vld [vmem:[#allocation11 + $0x348] sm:$0xf]  ;;  %v717_v34 = vperm.slane %v5683_v50, 3  ;;  %v3820_v35 = vor.u32 %v4844_v26, %v3819_v25 }
 0x11e   : > { %v4200_v48 = vor.u32 %v4935_v46, %v4197_v47  ;;  %v4485_v52 = vld [vmem:[#allocation11 + $0x660] sm:$0xf0]  ;;  %v4916_v32 = vld [vmem:[#allocation11 + $0x364] sm:$0xf0]  ;;  %v3917_v25 = vld [vmem:[#allocation11 + $0x1e8] sm:$0xf0] }
 0x11f   : > { %2775 = vmatpush.bf16.msra.mxu1 %v4104_v37  ;;  %2801 = vmatpush.bf16.msra.mxu3 %v4616_v24  ;;  %v5023_v37 = vld [vmem:[#allocation11 + $0x6c4] sm:$0xf]  ;;  %v3852_v24 = vor.u32 %v4852_v12, %v3851_v18  ;;  %v4075_v44 = vld [vmem:[#allocation11 + $0x308] sm:$0xf] }
 0x120   : > { %2764 = vmatpush.bf16.msra.mxu0 %v3784_v41  ;;  %2790 = vmatpush.bf16.msra.mxu2 %v4296_v27  ;;  %v4552_v39 = vor.u32 %v5023_v37, %v4549_v38  ;;  %v4229_v41 = vld [vmem:[#allocation11 + $0x460] sm:$0xf0]  ;;  %v4980_v6 = vld [vmem:[#allocation11 + $0x564] sm:$0xf0] }
 0x121   : > { %v4232_v42 = vor.u32 %v4943_v40, %v4229_v41  ;;  %v4999_v56 = vld [vmem:[#allocation11 + $0x604] sm:$0xf]  ;;  %v4427_v40 = vld [vmem:[#allocation11 + $0x5c8] sm:$0xf] }
 0x122   : > { %v4453_v57 = vld [vmem:[#allocation11 + $0x620] sm:$0xf0]  ;;  %v4996_v41 = vld [vmem:[#allocation11 + $0x5e4] sm:$0xf0] }
 0x123   : > { %2776 = vmatpush.bf16.msra.mxu1 %v4072_v51  ;;  %2802 = vmatpush.bf16.msra.mxu3 %v4584_v33  ;;  %v5007_v51 = vld [vmem:[#allocation11 + $0x644] sm:$0xf]  ;;  %v4456_v58 = vor.u32 %v4999_v56, %v4453_v57  ;;  %v4428_v47 = vor.u32 %v4996_v41, %v4427_v40  ;;  %v4043_v57 = vld [vmem:[#allocation11 + $0x2c8] sm:$0xf] }
 0x124   : > { %2765 = vmatpush.bf16.msra.mxu0 %v3752_v55  ;;  %2791 = vmatpush.bf16.msra.mxu2 %v4264_v36  ;;  %v4488_v53 = vor.u32 %v5007_v51, %v4485_v52  ;;  %v3787_v36 = vld [vmem:[#allocation11 + $0xc8] sm:$0xf] }
 0x125   : > { %v4892_v11 = vld [vmem:[#allocation11 + $0x2a4] sm:$0xf0] }
 0x126   : > { %v4651_v13 = vld [vmem:[#allocation11 + $0x788] sm:$0xf] }
 0x127   : > { %2777 = vmatpush.bf16.msra.mxu1 %v4040_v62  ;;  %2803 = vmatpush.bf16.msra.mxu3 %v4552_v39  ;;  %v4836_v39 = vld [vmem:[#allocation11 + $0xe4] sm:$0xf0] }
 0x128   : > { %2766 = vmatpush.bf16.msra.mxu0 %v3720_v4  ;;  %2792 = vmatpush.bf16.msra.mxu2 %v4232_v42  ;;  %v3916_v4 = vor.u32 %v4868_v1, %v3915_v0  ;;  %v4108_v42 = vor.u32 %v4916_v32, %v4107_v31  ;;  %v3788_v46 = vor.u32 %v4836_v39, %v3787_v36  ;;  %v3723_v1 = vld [vmem:[#allocation11 + $0x48] sm:$0xf] }
 0x129   : > { %v4812_v18 = vld [vmem:[#allocation11 + $0x24] sm:$0xf0] }
 0x12a   : > { %v4331_v12 = vld [vmem:[#allocation11 + $0x508] sm:$0xf] }
 0x12b   : > { %2778 = vmatpush.bf16.msra.mxu1 %v4008_v10  ;;  %2804 = vmatpush.bf16.msra.mxu3 %v4520_v45  ;;  %v4908_v45 = vld [vmem:[#allocation11 + $0x324] sm:$0xf0] }
 0x12c   : > { %2767 = vmatpush.bf16.msra.mxu0 %v3688_v16  ;;  %2793 = vmatpush.bf16.msra.mxu2 %v4200_v48  ;;  %v3755_v48 = vld [vmem:[#allocation11 + $0x88] sm:$0xf]  ;;  %v4076_v56 = vor.u32 %v4908_v45, %v4075_v44  ;;  %v4928_v44 = vld [vmem:[#allocation11 + $0x3cc] sm:$0xf] }
 0x12d   : > { %v3979_v26 = vld [vmem:[#allocation11 + $0x248] sm:$0xf]  ;;  %v4173_v45 = vld [vmem:[#allocation11 + $0x3e8] sm:$0xf0] }
 0x12e   : > { %v3947_v39 = vld [vmem:[#allocation11 + $0x208] sm:$0xf] }
 0x12f   : > { %2779 = vmatpush.bf16.msra.mxu1 %v3976_v21  ;;  %2805 = vmatpush.bf16.msra.mxu3 %v4488_v53  ;;  %v716_v21 = vperm.slane %v5683_v50, 2  ;;  %v4828_v50 = vld [vmem:[#allocation11 + $0xa4] sm:$0xf0] }
 0x130   : > { %v4395_v53 = vld [vmem:[#allocation11 + $0x588] sm:$0xf] }
 0x131   : > { %v4876_v40 = vld [vmem:[#allocation11 + $0x224] sm:$0xf0] }
 0x132   : > { %v4587_v41 = vld [vmem:[#allocation11 + $0x708] sm:$0xf] }
 0x133   : > { %2780 = vmatpush.bf16.msra.mxu1 %v3944_v30  ;;  %2806 = vmatpush.bf16.msra.mxu3 %v4456_v58 }
 0x16b   : > { %v1051_v55 = vpop.f32.mrf.mxu0 }
 0x16c   : > { %v1052_v59 = vadd.f32 %v1051_v55, %v714_v54  ;;  %v4988_v54 = vld [vmem:[#allocation11 + $0x5a4] sm:$0xf0] }
 0x16d   : > { %v4396_v0 = vor.u32 %v4988_v54, %v4395_v53  ;;  %v4848_v53 = vld [vmem:[#allocation11 + $0x14c] sm:$0xf] }
 0x16e   : > { %v3853_v54 = vld [vmem:[#allocation11 + $0x168] sm:$0xf0] }
 0x171   : > { %v1077_v49 = vpop.f32.mrf.mxu2 }
 0x172   : > { %v1078_v3 = vadd.f32 %v1077_v49, %v715_v60  ;;  %v4900_v60 = vld [vmem:[#allocation11 + $0x2e4] sm:$0xf0] }
 0x173   : > { %v1064_v61 = vpop.f32.mrf.mxu1  ;;  %v1053_v63 = vpop.f32.mrf.mxu0  ;;  %v4683_v49 = vld [vmem:[#allocation11 + $0x7c8] sm:$0xf]  ;;  %v4044_v7 = vor.u32 %v4900_v60, %v4043_v57  ;;  %v4141_v60 = vld [vmem:[#allocation11 + $0x3a8] sm:$0xf0] }
 0x174   : > { %v1065_v62 = vadd.f32 %v1064_v61, %v1052_v59  ;;  %v5060_v61 = vld [vmem:[#allocation11 + $0x7e4] sm:$0xf0]  ;;  %v3756_v63 = vor.u32 %v4828_v50, %v3755_v48 }
 0x175   : > { %v4956_v48 = vld [vmem:[#allocation11 + $0x4a4] sm:$0xf0] }
 0x176   : > { %v1146_v2 = vmax.f32 %v1065_v62, 0.0  ;;  %v5028_v57 = vld [vmem:[#allocation11 + $0x6e4] sm:$0xf0] }
 0x178   : > { %v5687_v5 = vpack.c.bf16 %v1146_v2, %v1146_v2  ;;  %v4820_v2 = vld [vmem:[#allocation11 + $0x64] sm:$0xf0] }
 0x179   : > { %v1090_v8 = vpop.f32.mrf.mxu3  ;;  %v1079_v10 = vpop.f32.mrf.mxu2 }
 0x17a   : > { %v1091_v9 = vadd.f32 %v1090_v8, %v1078_v3  ;;  %2716 = vmatmul.bf16.vlgmr.msrb.gmra.mxu0 %v5687_v5  ;;  %v4684_v8 = vor.u32 %v5060_v61, %v4683_v49  ;;  %v3856_v49 = vor.u32 %v4848_v53, %v3853_v54  ;;  %v4235_v61 = vld [vmem:[#allocation11 + $0x448] sm:$0xf]  ;;  %v4653_v53 = vld [vmem:[#allocation11 + $0x7a8] sm:$0xf0] }
 0x17b   : > { %2812 = vmatpush.bf16.msrb.mxu0 %v3916_v4  ;;  %v1066_v14 = vpop.f32.mrf.mxu1  ;;  %v1103_v17 = vpop.f32.mrf.mxu0  ;;  %v4363_v4 = vld [vmem:[#allocation11 + $0x548] sm:$0xf] }
 0x17c   : > { %v1147_v16 = vmax.f32 %v1091_v9, 0.0  ;;  %v1104_v29 = vadd.f32 %v1103_v17, %v716_v21  ;;  %v4011_v9 = vld [vmem:[#allocation11 + $0x288] sm:$0xf] }
 0x17d   : > { %v5052_v14 = vld [vmem:[#allocation11 + $0x7a4] sm:$0xf0]  ;;  %v4012_v22 = vor.u32 %v4892_v11, %v4011_v9 }
 0x17e   : > { %v5690_v20 = vpack.c.bf16 %v1147_v16, %v1147_v16  ;;  %v4364_v16 = vor.u32 %v4980_v6, %v4363_v4  ;;  %v3691_v17 = vld [vmem:[#allocation11 + $0x8] sm:$0xf]  ;;  %v4652_v23 = vor.u32 %v5052_v14, %v4651_v13  ;;  %v4832_v14 = vld [vmem:[#allocation11 + $0xcc] sm:$0xf] }
 0x17f   : > { %2813 = vmatpush.bf16.msrb.mxu0 %v3884_v15  ;;  %v3724_v15 = vor.u32 %v4820_v2, %v3723_v1  ;;  %v3821_v1 = vld [vmem:[#allocation11 + $0x128] sm:$0xf0]  ;;  %v5020_v4 = vld [vmem:[#allocation11 + $0x6a4] sm:$0xf0] }
 0x180   : > { %2729 = vmatmul.bf16.vlgmr.msrb.gmra.mxu1 %v5690_v20  ;;  %v4203_v11 = vld [vmem:[#allocation11 + $0x408] sm:$0xf] }
 0x181   : > { %2825 = vmatpush.bf16.msrb.mxu1 %v4172_v19  ;;  %v1092_v27 = vpop.f32.mrf.mxu3  ;;  %v1129_v30 = vpop.f32.mrf.mxu2  ;;  %v4972_v19 = vld [vmem:[#allocation11 + $0x524] sm:$0xf0] }
 0x182   : > { %v1130_v52 = vadd.f32 %v1129_v30, %v717_v34  ;;  %v4884_v27 = vld [vmem:[#allocation11 + $0x264] sm:$0xf0]  ;;  %v3692_v30 = vor.u32 %v4812_v18, %v3691_v17  ;;  %v4332_v31 = vor.u32 %v4972_v19, %v4331_v12  ;;  %v4992_v17 = vld [vmem:[#allocation11 + $0x5cc] sm:$0xf] }
 0x183   : > { %2814 = vmatpush.bf16.msrb.mxu0 %v3852_v24  ;;  %v1116_v33 = vpop.f32.mrf.mxu1  ;;  %v1105_v38 = vpop.f32.mrf.mxu0  ;;  %v4864_v24 = vld [vmem:[#allocation11 + $0x1cc] sm:$0xf]  ;;  %v4964_v34 = vld [vmem:[#allocation11 + $0x4e4] sm:$0xf0] }
 0x184   : > { %v1117_v37 = vadd.f32 %v1116_v33, %v1104_v29  ;;  %v5044_v29 = vld [vmem:[#allocation11 + $0x764] sm:$0xf0]  ;;  %v3920_v32 = vor.u32 %v4864_v24, %v3917_v25  ;;  %v3885_v38 = vld [vmem:[#allocation11 + $0x1a8] sm:$0xf0] }
 0x185   : > { %2826 = vmatpush.bf16.msrb.mxu1 %v4140_v28  ;;  %v4619_v28 = vld [vmem:[#allocation11 + $0x748] sm:$0xf]  ;;  %v4429_v18 = vld [vmem:[#allocation11 + $0x5e8] sm:$0xf0] }
 0x186   : > { %v1148_v43 = vmax.f32 %v1117_v37, 0.0  ;;  %v4299_v33 = vld [vmem:[#allocation11 + $0x4c8] sm:$0xf]  ;;  %v4620_v36 = vor.u32 %v5044_v29, %v4619_v28  ;;  %v4856_v37 = vld [vmem:[#allocation11 + $0x18c] sm:$0xf] }
 0x187   : > { %2815 = vmatpush.bf16.msrb.mxu0 %v3820_v35  ;;  %v3980_v35 = vor.u32 %v4884_v27, %v3979_v26  ;;  %v4940_v13 = vld [vmem:[#allocation11 + $0x424] sm:$0xf0]  ;;  %v4077_v24 = vld [vmem:[#allocation11 + $0x328] sm:$0xf0]  ;;  %v4432_v26 = vor.u32 %v4992_v17, %v4429_v18 }
 0x188   : > { %v5695_v51 = vpack.c.bf16 %v1148_v43, %v1148_v43  ;;  %v4300_v43 = vor.u32 %v4964_v34, %v4299_v33  ;;  %v4491_v19 = vld [vmem:[#allocation11 + $0x648] sm:$0xf]  ;;  %v4824_v27 = vld [vmem:[#allocation11 + $0x8c] sm:$0xf] }
 0x189   : > { %2827 = vmatpush.bf16.msrb.mxu1 %v4108_v42  ;;  %v1142_v55 = vpop.f32.mrf.mxu3  ;;  %v1131_v59 = vpop.f32.mrf.mxu2  ;;  %v5036_v42 = vld [vmem:[#allocation11 + $0x724] sm:$0xf0]  ;;  %v3757_v29 = vld [vmem:[#allocation11 + $0xa8] sm:$0xf0] }
 0x18a   : > { %v1143_v58 = vadd.f32 %v1142_v55, %v1130_v52  ;;  %2742 = vmatmul.bf16.vlgmr.msrb.gmra.mxu2 %v5695_v51  ;;  %2768 = vmatmul.bf16.vlgmr.msra.gmra.mxu0 %v5687_v5  ;;  %v3948_v52 = vor.u32 %v4876_v40, %v3947_v39  ;;  %v4588_v50 = vor.u32 %v5036_v42, %v4587_v41  ;;  %v4920_v59 = vld [vmem:[#allocation11 + $0x38c] sm:$0xf]  ;;  %v4459_v33 = vld [vmem:[#allocation11 + $0x608] sm:$0xf] }
 0x18b   : > { %2816 = vmatpush.bf16.msrb.mxu0 %v3788_v46  ;;  %2838 = vmatpush.bf16.msrb.mxu2 %v4428_v47  ;;  %v1118_v62 = vpop.f32.mrf.mxu1  ;;  %v3888_v46 = vor.u32 %v4856_v37, %v3885_v38  ;;  %v4267_v47 = vld [vmem:[#allocation11 + $0x488] sm:$0xf]  ;;  %v4176_v55 = vor.u32 %v4928_v44, %v4173_v45  ;;  %v4144_v2 = vor.u32 %v4920_v59, %v4141_v60  ;;  %v5056_v37 = vld [vmem:[#allocation11 + $0x7cc] sm:$0xf] }
 0x18c   : > { %v1149_v3 = vmax.f32 %v1143_v58, 0.0  ;;  %v4268_v58 = vor.u32 %v4956_v48, %v4267_v47  ;;  %v4948_v62 = vld [vmem:[#allocation11 + $0x464] sm:$0xf0]  ;;  %v4685_v38 = vld [vmem:[#allocation11 + $0x7e8] sm:$0xf0]  ;;  %v3760_v39 = vor.u32 %v4824_v27, %v3757_v29 }
 0x18d   : > { %2828 = vmatpush.bf16.msrb.mxu1 %v4076_v56  ;;  %v4555_v56 = vld [vmem:[#allocation11 + $0x6c8] sm:$0xf]  ;;  %v4236_v6 = vor.u32 %v4948_v62, %v4235_v61  ;;  %v4816_v41 = vld [vmem:[#allocation11 + $0x4c] sm:$0xf]  ;;  %v4688_v47 = vor.u32 %v5056_v37, %v4685_v38  ;;  %v3923_v61 = vld [vmem:[#allocation11 + $0x1d0] sm:$0xf] }
 0x18e   : > { %v5699_v10 = vpack.c.bf16 %v1149_v3, %v1149_v3  ;;  %v4523_v3 = vld [vmem:[#allocation11 + $0x688] sm:$0xf]  ;;  %v4976_v44 = vld [vmem:[#allocation11 + $0x54c] sm:$0xf]  ;;  %v4869_v62 = vld [vmem:[#allocation11 + $0x1ec] sm:$0xf0] }
 0x18f   : > { %2817 = vmatpush.bf16.msrb.mxu0 %v3756_v63  ;;  %2839 = vmatpush.bf16.msrb.mxu2 %v4396_v0  ;;  %v4556_v63 = vor.u32 %v5028_v57, %v4555_v56  ;;  %v4840_v0 = vld [vmem:[#allocation11 + $0x10c] sm:$0xf]  ;;  %v5004_v34 = vld [vmem:[#allocation11 + $0x624] sm:$0xf0]  ;;  %v3859_v27 = vld [vmem:[#allocation11 + $0x150] sm:$0xf] }
 0x190   : > { %2755 = vmatmul.bf16.vlgmr.msrb.gmra.mxu3 %v5699_v10  ;;  %2781 = vmatmul.bf16.vlgmr.msra.gmra.mxu1 %v5690_v20  ;;  %v3824_v9 = vor.u32 %v4840_v0, %v3821_v1  ;;  %v4460_v42 = vor.u32 %v5004_v34, %v4459_v33  ;;  %v4365_v45 = vld [vmem:[#allocation11 + $0x568] sm:$0xf0]  ;;  %v4147_v33 = vld [vmem:[#allocation11 + $0x390] sm:$0xf] }
 0x191   : > { %2829 = vmatpush.bf16.msrb.mxu1 %v4044_v7  ;;  %2851 = vmatpush.bf16.msrb.mxu3 %v4684_v8  ;;  %v1144_v21 = vpop.f32.mrf.mxu3  ;;  %v4912_v7 = vld [vmem:[#allocation11 + $0x34c] sm:$0xf]  ;;  %v4925_v34 = vld [vmem:[#allocation11 + $0x3ac] sm:$0xf0] }
 0x192   : > { %v4109_v8 = vld [vmem:[#allocation11 + $0x368] sm:$0xf0]  ;;  %v5012_v21 = vld [vmem:[#allocation11 + $0x664] sm:$0xf0] }
 0x193   : > { %2818 = vmatpush.bf16.msrb.mxu0 %v3724_v15  ;;  %2840 = vmatpush.bf16.msrb.mxu2 %v4364_v16  ;;  %v4524_v15 = vor.u32 %v5020_v4, %v4523_v3  ;;  %v3789_v16 = vld [vmem:[#allocation11 + $0xe8] sm:$0xf0]  ;;  %v4112_v12 = vor.u32 %v4912_v7, %v4109_v8  ;;  %v4492_v28 = vor.u32 %v5012_v21, %v4491_v19  ;;  %v4179_v19 = vld [vmem:[#allocation11 + $0x3d0] sm:$0xf] }
 0x194   : > { %v3792_v25 = vor.u32 %v4832_v14, %v3789_v16  ;;  %v4888_v48 = vld [vmem:[#allocation11 + $0x28c] sm:$0xf]  ;;  %v4861_v14 = vld [vmem:[#allocation11 + $0x1ac] sm:$0xf0] }
 0x195   : > { %2830 = vmatpush.bf16.msrb.mxu1 %v4012_v22  ;;  %2852 = vmatpush.bf16.msrb.mxu3 %v4652_v23  ;;  %v4204_v22 = vor.u32 %v4940_v13, %v4203_v11  ;;  %v4904_v23 = vld [vmem:[#allocation11 + $0x30c] sm:$0xf]  ;;  %v3891_v13 = vld [vmem:[#allocation11 + $0x190] sm:$0xf] }
 0x196   : > { %v4808_v56 = vld [vmem:[#allocation11 + $0xc] sm:$0xf]  ;;  %v4933_v21 = vld [vmem:[#allocation11 + $0x3ec] sm:$0xf0] }
 0x197   : > { %2819 = vmatpush.bf16.msrb.mxu0 %v3692_v30  ;;  %2841 = vmatpush.bf16.msrb.mxu2 %v4332_v31  ;;  %v4984_v30 = vld [vmem:[#allocation11 + $0x58c] sm:$0xf]  ;;  %v4180_v29 = vor.u32 %v4933_v21, %v4179_v19 }
 0x198   : > { %v4397_v31 = vld [vmem:[#allocation11 + $0x5a8] sm:$0xf0] }
 0x199   : > { %2831 = vmatpush.bf16.msrb.mxu1 %v3980_v35  ;;  %2853 = vmatpush.bf16.msrb.mxu3 %v4620_v36  ;;  %v4896_v35 = vld [vmem:[#allocation11 + $0x2cc] sm:$0xf]  ;;  %v4400_v40 = vor.u32 %v4984_v30, %v4397_v31 }
 0x19a   : > { %2794 = vmatmul.bf16.vlgmr.msra.gmra.mxu2 %v5695_v51  ;;  %2820 = vmatmul.bf16.vlgmr.msrb.gmra.mxu0 %v5687_v5  ;;  %v4045_v36 = vld [vmem:[#allocation11 + $0x2e8] sm:$0xf0] }
 0x19b   : > { %2864 = vmatpush.bf16.msra.mxu0 %v3920_v32  ;;  %2842 = vmatpush.bf16.msrb.mxu2 %v4300_v43  ;;  %v4080_v32 = vor.u32 %v4904_v23, %v4077_v24  ;;  %v3725_v43 = vld [vmem:[#allocation11 + $0x68] sm:$0xf0] }
 0x19c   : > { %v3728_v54 = vor.u32 %v4816_v41, %v3725_v43  ;;  %v3693_v57 = vld [vmem:[#allocation11 + $0x28] sm:$0xf0]  ;;  %v4148_v41 = vor.u32 %v4925_v34, %v4147_v33  ;;  %v4973_v33 = vld [vmem:[#allocation11 + $0x52c] sm:$0xf0] }
 0x19d   : > { %2832 = vmatpush.bf16.msrb.mxu1 %v3948_v52  ;;  %2854 = vmatpush.bf16.msrb.mxu3 %v4588_v50  ;;  %v4013_v52 = vld [vmem:[#allocation11 + $0x2a8] sm:$0xf0]  ;;  %v3696_v3 = vor.u32 %v4808_v56, %v3693_v57  ;;  %v4997_v56 = vld [vmem:[#allocation11 + $0x5ec] sm:$0xf0] }
 0x19e   : > { %v5048_v50 = vld [vmem:[#allocation11 + $0x78c] sm:$0xf]  ;;  %v4016_v60 = vor.u32 %v4888_v48, %v4013_v52 }
 0x19f   : > { %2865 = vmatpush.bf16.msra.mxu0 %v3888_v46  ;;  %2843 = vmatpush.bf16.msrb.mxu2 %v4268_v58  ;;  %v4048_v46 = vor.u32 %v4896_v35, %v4045_v36  ;;  %v4968_v58 = vld [vmem:[#allocation11 + $0x50c] sm:$0xf] }
 0x1a0   : > { %2807 = vmatmul.bf16.vlgmr.msra.gmra.mxu3 %v5699_v10  ;;  %2833 = vmatmul.bf16.vlgmr.msrb.gmra.mxu1 %v5690_v20  ;;  %v4333_v59 = vld [vmem:[#allocation11 + $0x528] sm:$0xf0] }
 0x1a1   : > { %2877 = vmatpush.bf16.msra.mxu1 %v4176_v55  ;;  %2855 = vmatpush.bf16.msrb.mxu3 %v4556_v63  ;;  %v4368_v55 = vor.u32 %v4976_v44, %v4365_v45  ;;  %v4880_v63 = vld [vmem:[#allocation11 + $0x24c] sm:$0xf]  ;;  %v4336_v4 = vor.u32 %v4968_v58, %v4333_v59  ;;  %v4115_v45 = vld [vmem:[#allocation11 + $0x350] sm:$0xf] }
 0x1a2   : > { %v3981_v0 = vld [vmem:[#allocation11 + $0x268] sm:$0xf0] }
 0x1a3   : > { %2866 = vmatpush.bf16.msra.mxu0 %v3856_v49  ;;  %2844 = vmatpush.bf16.msrb.mxu2 %v4236_v6  ;;  %v4656_v49 = vor.u32 %v5048_v50, %v4653_v53  ;;  %v5040_v1 = vld [vmem:[#allocation11 + $0x74c] sm:$0xf]  ;;  %v3924_v6 = vor.u32 %v4869_v62, %v3923_v61  ;;  %v3795_v50 = vld [vmem:[#allocation11 + $0xd0] sm:$0xf] }
 0x1a4   : > { %v4960_v7 = vld [vmem:[#allocation11 + $0x4cc] sm:$0xf]  ;;  %v4909_v61 = vld [vmem:[#allocation11 + $0x32c] sm:$0xf0] }
 0x1a5   : > { %2878 = vmatpush.bf16.msra.mxu1 %v4144_v2  ;;  %2856 = vmatpush.bf16.msrb.mxu3 %v4524_v15  ;;  %v4621_v2 = vld [vmem:[#allocation11 + $0x768] sm:$0xf0] }
 0x1a6   : > { %v4301_v8 = vld [vmem:[#allocation11 + $0x4e8] sm:$0xf0]  ;;  %v4624_v11 = vor.u32 %v5040_v1, %v4621_v2  ;;  %v4829_v2 = vld [vmem:[#allocation11 + $0xac] sm:$0xf0] }
 0x1a7   : > { %2867 = vmatpush.bf16.msra.mxu0 %v3824_v9  ;;  %2845 = vmatpush.bf16.msrb.mxu2 %v4204_v22  ;;  %v3984_v9 = vor.u32 %v4880_v63, %v3981_v0  ;;  %v4872_v15 = vld [vmem:[#allocation11 + $0x20c] sm:$0xf]  ;;  %v3892_v22 = vor.u32 %v4861_v14, %v3891_v13  ;;  %v3763_v0 = vld [vmem:[#allocation11 + $0x90] sm:$0xf] }
 0x1a8   : > { %v3949_v16 = vld [vmem:[#allocation11 + $0x228] sm:$0xf0]  ;;  %v4691_v13 = vld [vmem:[#allocation11 + $0x7d0] sm:$0xf] }
 0x1a9   : > { %2879 = vmatpush.bf16.msra.mxu1 %v4112_v12  ;;  %2857 = vmatpush.bf16.msrb.mxu3 %v4492_v28  ;;  %v5032_v17 = vld [vmem:[#allocation11 + $0x70c] sm:$0xf]  ;;  %v4304_v12 = vor.u32 %v4960_v7, %v4301_v8  ;;  %v4853_v28 = vld [vmem:[#allocation11 + $0x16c] sm:$0xf0] }
 0x1aa   : > { %2846 = vmatmul.bf16.vlgmr.msrb.gmra.mxu2 %v5695_v51  ;;  %v4589_v18 = vld [vmem:[#allocation11 + $0x728] sm:$0xf0]  ;;  %v3860_v35 = vor.u32 %v4853_v28, %v3859_v27  ;;  %v5061_v14 = vld [vmem:[#allocation11 + $0x7ec] sm:$0xf0] }
 0x1ab   : > { %2868 = vmatpush.bf16.msra.mxu0 %v3792_v25  ;;  %2890 = vmatpush.bf16.msra.mxu2 %v4432_v26  ;;  %v4952_v23 = vld [vmem:[#allocation11 + $0x48c] sm:$0xf]  ;;  %v3952_v25 = vor.u32 %v4872_v15, %v3949_v16  ;;  %v4592_v26 = vor.u32 %v5032_v17, %v4589_v18  ;;  %v3764_v15 = vor.u32 %v4829_v2, %v3763_v0  ;;  %v3731_v18 = vld [vmem:[#allocation11 + $0x50] sm:$0xf]  ;;  %v4849_v0 = vld [vmem:[#allocation11 + $0x154] sm:$0xf] }
 0x1ac   : > { %v4269_v24 = vld [vmem:[#allocation11 + $0x4a8] sm:$0xf0]  ;;  %v4692_v21 = vor.u32 %v5061_v14, %v4691_v13  ;;  %v5053_v27 = vld [vmem:[#allocation11 + $0x7ac] sm:$0xf0]  ;;  %v3861_v2 = vld [vmem:[#allocation11 + $0x170] sm:$0xf0] }
 0x1ad   : > { %2880 = vmatpush.bf16.msra.mxu1 %v4080_v32  ;;  %2858 = vmatpush.bf16.msrb.mxu3 %v4460_v42  ;;  %v5024_v30 = vld [vmem:[#allocation11 + $0x6cc] sm:$0xf]  ;;  %v4272_v32 = vor.u32 %v4952_v23, %v4269_v24  ;;  %v4981_v23 = vld [vmem:[#allocation11 + $0x56c] sm:$0xf0] }
 0x1ae   : > { %v4557_v31 = vld [vmem:[#allocation11 + $0x6e8] sm:$0xf0]  ;;  %v4019_v24 = vld [vmem:[#allocation11 + $0x290] sm:$0xf] }
 0x1af   : > { %2869 = vmatpush.bf16.msra.mxu0 %v3760_v39  ;;  %2891 = vmatpush.bf16.msra.mxu2 %v4400_v40  ;;  %v4944_v36 = vld [vmem:[#allocation11 + $0x44c] sm:$0xf]  ;;  %v4560_v38 = vor.u32 %v5024_v30, %v4557_v31  ;;  %v3827_v39 = vld [vmem:[#allocation11 + $0x110] sm:$0xf] }
 0x1b0   : > { %2859 = vmatmul.bf16.vlgmr.msrb.gmra.mxu3 %v5699_v10  ;;  %v4237_v37 = vld [vmem:[#allocation11 + $0x468] sm:$0xf0]  ;;  %v4845_v40 = vld [vmem:[#allocation11 + $0x12c] sm:$0xf0] }
 0x1b1   : > { %2881 = vmatpush.bf16.msra.mxu1 %v4048_v46  ;;  %2903 = vmatpush.bf16.msra.mxu3 %v4688_v47  ;;  %v5016_v42 = vld [vmem:[#allocation11 + $0x68c] sm:$0xf]  ;;  %v4240_v44 = vor.u32 %v4944_v36, %v4237_v37  ;;  %v4917_v46 = vld [vmem:[#allocation11 + $0x36c] sm:$0xf0]  ;;  %v3828_v47 = vor.u32 %v4845_v40, %v3827_v39  ;;  %v4865_v36 = vld [vmem:[#allocation11 + $0x1d4] sm:$0xf] }
 0x1b2   : > { %v4525_v43 = vld [vmem:[#allocation11 + $0x6a8] sm:$0xf0]  ;;  %v4116_v57 = vor.u32 %v4917_v46, %v4115_v45  ;;  %v4813_v31 = vld [vmem:[#allocation11 + $0x2c] sm:$0xf0]  ;;  %v3925_v37 = vld [vmem:[#allocation11 + $0x1f0] sm:$0xf0] }
 0x1b3   : > { %2870 = vmatpush.bf16.msra.mxu0 %v3728_v54  ;;  %2892 = vmatpush.bf16.msra.mxu2 %v4368_v55  ;;  %v4936_v48 = vld [vmem:[#allocation11 + $0x40c] sm:$0xf]  ;;  %v4528_v53 = vor.u32 %v5016_v42, %v4525_v43  ;;  %v4837_v54 = vld [vmem:[#allocation11 + $0xec] sm:$0xf0] }
 0x1b4   : > { %v4205_v52 = vld [vmem:[#allocation11 + $0x428] sm:$0xf0]  ;;  %v4435_v55 = vld [vmem:[#allocation11 + $0x5d0] sm:$0xf]  ;;  %v3796_v62 = vor.u32 %v4837_v54, %v3795_v50  ;;  %v3893_v50 = vld [vmem:[#allocation11 + $0x1b0] sm:$0xf0] }
 0x1b5   : > { %2882 = vmatpush.bf16.msra.mxu1 %v4016_v60  ;;  %2904 = vmatpush.bf16.msra.mxu3 %v4656_v49  ;;  %v5008_v58 = vld [vmem:[#allocation11 + $0x64c] sm:$0xf]  ;;  %v4208_v60 = vor.u32 %v4936_v48, %v4205_v52  ;;  %v4083_v49 = vld [vmem:[#allocation11 + $0x310] sm:$0xf]  ;;  %v4436_v63 = vor.u32 %v4997_v56, %v4435_v55  ;;  %v4857_v52 = vld [vmem:[#allocation11 + $0x194] sm:$0xf] }
 0x1b6   : > { %v4493_v59 = vld [vmem:[#allocation11 + $0x668] sm:$0xf0]  ;;  %v4885_v39 = vld [vmem:[#allocation11 + $0x26c] sm:$0xf0] }
 0x1b7   : > { %2871 = vmatpush.bf16.msra.mxu0 %v3696_v3  ;;  %2893 = vmatpush.bf16.msra.mxu2 %v4336_v4  ;;  %v4496_v1 = vor.u32 %v5008_v58, %v4493_v59  ;;  %v4403_v3 = vld [vmem:[#allocation11 + $0x590] sm:$0xf]  ;;  %v5000_v7 = vld [vmem:[#allocation11 + $0x60c] sm:$0xf]  ;;  %v4181_v58 = vld [vmem:[#allocation11 + $0x3f0] sm:$0xf0] }
 0x1b8   : > { %v4989_v4 = vld [vmem:[#allocation11 + $0x5ac] sm:$0xf0]  ;;  %v4461_v8 = vld [vmem:[#allocation11 + $0x628] sm:$0xf0] }
 0x1b9   : > { %2883 = vmatpush.bf16.msra.mxu1 %v3984_v9  ;;  %2905 = vmatpush.bf16.msra.mxu3 %v4624_v11  ;;  %v4051_v9 = vld [vmem:[#allocation11 + $0x2d0] sm:$0xf]  ;;  %v4404_v16 = vor.u32 %v4989_v4, %v4403_v3  ;;  %v4464_v17 = vor.u32 %v5000_v7, %v4461_v8  ;;  %v4149_v7 = vld [vmem:[#allocation11 + $0x3b0] sm:$0xf0] }
 0x1ba   : > { %2872 = vmatmul.bf16.vlgmr.msra.gmra.mxu0 %v5687_v5  ;;  %v4901_v11 = vld [vmem:[#allocation11 + $0x2ec] sm:$0xf0] }
 0x1bb   : > { %2916 = vmatpush.bf16.msrb.mxu0 %v3924_v6  ;;  %2894 = vmatpush.bf16.msra.mxu2 %v4304_v12  ;;  %v4084_v6 = vor.u32 %v4909_v61, %v4083_v49  ;;  %v4821_v12 = vld [vmem:[#allocation11 + $0x6c] sm:$0xf0]  ;;  %v4052_v19 = vor.u32 %v4901_v11, %v4051_v9  ;;  %v3864_v9 = vor.u32 %v4849_v0, %v3861_v2  ;;  %v4661_v0 = vld [vmem:[#allocation11 + $0x7b0] sm:$0xf0] }
 0x1bc   : > { %v3732_v28 = vor.u32 %v4821_v12, %v3731_v18  ;;  %v4627_v40 = vld [vmem:[#allocation11 + $0x750] sm:$0xf]  ;;  %v4809_v2 = vld [vmem:[#allocation11 + $0x14] sm:$0xf] }
 0x1bd   : > { %2884 = vmatpush.bf16.msra.mxu1 %v3952_v25  ;;  %2906 = vmatpush.bf16.msra.mxu3 %v4592_v26  ;;  %v4893_v25 = vld [vmem:[#allocation11 + $0x2ac] sm:$0xf0] }
 0x1be   : > { %v4659_v26 = vld [vmem:[#allocation11 + $0x790] sm:$0xf]  ;;  %v4020_v34 = vor.u32 %v4893_v25, %v4019_v24 }
 0x1bf   : > { %2917 = vmatpush.bf16.msrb.mxu0 %v3892_v22  ;;  %2895 = vmatpush.bf16.msra.mxu2 %v4272_v32  ;;  %v4371_v22 = vld [vmem:[#allocation11 + $0x550] sm:$0xf] }
 0x1c0   : > { %2885 = vmatmul.bf16.vlgmr.msra.gmra.mxu1 %v5690_v20  ;;  %v4372_v30 = vor.u32 %v4981_v23, %v4371_v22  ;;  %v4339_v32 = vld [vmem:[#allocation11 + $0x510] sm:$0xf] }
 0x1c1   : > { %2929 = vmatpush.bf16.msrb.mxu1 %v4180_v29  ;;  %2907 = vmatpush.bf16.msra.mxu3 %v4560_v38  ;;  %v3699_v29 = vld [vmem:[#allocation11 + $0x10] sm:$0xf]  ;;  %v4340_v43 = vor.u32 %v4973_v33, %v4339_v32 }
 0x1c2   : > { %v3987_v38 = vld [vmem:[#allocation11 + $0x250] sm:$0xf]  ;;  %v3700_v42 = vor.u32 %v4813_v31, %v3699_v29  ;;  %v4437_v31 = vld [vmem:[#allocation11 + $0x5f0] sm:$0xf0] }
 0x1c3   : > { %2918 = vmatpush.bf16.msrb.mxu0 %v3860_v35  ;;  %2896 = vmatpush.bf16.msra.mxu2 %v4240_v44  ;;  %v4660_v35 = vor.u32 %v5053_v27, %v4659_v26  ;;  %v3928_v44 = vor.u32 %v4865_v36, %v3925_v37  ;;  %v4307_v45 = vld [vmem:[#allocation11 + $0x4d0] sm:$0xf]  ;;  %v4833_v27 = vld [vmem:[#allocation11 + $0xd4] sm:$0xf] }
 0x1c4   : > { %v4965_v46 = vld [vmem:[#allocation11 + $0x4ec] sm:$0xf0] }
 0x1c5   : > { %2930 = vmatpush.bf16.msrb.mxu1 %v4148_v41  ;;  %2908 = vmatpush.bf16.msra.mxu3 %v4528_v53  ;;  %v5045_v41 = vld [vmem:[#allocation11 + $0x76c] sm:$0xf0]  ;;  %v4308_v59 = vor.u32 %v4965_v46, %v4307_v45 }
 0x1c6   : > { %v4628_v48 = vor.u32 %v5045_v41, %v4627_v40  ;;  %v3955_v53 = vld [vmem:[#allocation11 + $0x210] sm:$0xf]  ;;  %v3765_v40 = vld [vmem:[#allocation11 + $0xb0] sm:$0xf0] }
 0x1c7   : > { %2919 = vmatpush.bf16.msrb.mxu0 %v3828_v47  ;;  %2897 = vmatpush.bf16.msra.mxu2 %v4208_v60  ;;  %v3988_v47 = vor.u32 %v4885_v39, %v3987_v38  ;;  %v4877_v54 = vld [vmem:[#allocation11 + $0x22c] sm:$0xf0]  ;;  %v3896_v60 = vor.u32 %v4857_v52, %v3893_v50  ;;  %v4825_v39 = vld [vmem:[#allocation11 + $0x94] sm:$0xf] }
 0x1c8   : > { %v4595_v55 = vld [vmem:[#allocation11 + $0x710] sm:$0xf]  ;;  %v3956_v49 = vor.u32 %v4877_v54, %v3955_v53  ;;  %v5057_v52 = vld [vmem:[#allocation11 + $0x7d4] sm:$0xf]  ;;  %v3768_v53 = vor.u32 %v4825_v39, %v3765_v40  ;;  %v3867_v39 = vld [vmem:[#allocation11 + $0x158] sm:$0xf] }
 0x1c9   : > { %2931 = vmatpush.bf16.msrb.mxu1 %v4116_v57  ;;  %2909 = vmatpush.bf16.msra.mxu3 %v4496_v1  ;;  %v5037_v56 = vld [vmem:[#allocation11 + $0x72c] sm:$0xf0]  ;;  %v4929_v57 = vld [vmem:[#allocation11 + $0x3d4] sm:$0xf] }
 0x1ca   : > { %2898 = vmatmul.bf16.vlgmr.msra.gmra.mxu2 %v5695_v51  ;;  %v4596_v61 = vor.u32 %v5037_v56, %v4595_v55  ;;  %v4184_v1 = vor.u32 %v4929_v57, %v4181_v58  ;;  %v4563_v3 = vld [vmem:[#allocation11 + $0x6d0] sm:$0xf]  ;;  %v4693_v50 = vld [vmem:[#allocation11 + $0x7f0] sm:$0xf0] }
 0x1cb   : > { %2920 = vmatpush.bf16.msrb.mxu0 %v3796_v62  ;;  %2942 = vmatpush.bf16.msrb.mxu2 %v4436_v63  ;;  %v4275_v62 = vld [vmem:[#allocation11 + $0x490] sm:$0xf]  ;;  %v4817_v57 = vld [vmem:[#allocation11 + $0x54] sm:$0xf] }
 0x1cc   : > { %v4957_v63 = vld [vmem:[#allocation11 + $0x4ac] sm:$0xf0]  ;;  %v3733_v58 = vld [vmem:[#allocation11 + $0x70] sm:$0xf0] }
 0x1cd   : > { %2932 = vmatpush.bf16.msrb.mxu1 %v4084_v6  ;;  %2910 = vmatpush.bf16.msra.mxu3 %v4464_v17  ;;  %v5029_v4 = vld [vmem:[#allocation11 + $0x6ec] sm:$0xf0]  ;;  %v4921_v6 = vld [vmem:[#allocation11 + $0x394] sm:$0xf]  ;;  %v4276_v8 = vor.u32 %v4957_v63, %v4275_v62 }
 0x1ce   : > { %v4564_v11 = vor.u32 %v5029_v4, %v4563_v3  ;;  %v4243_v13 = vld [vmem:[#allocation11 + $0x450] sm:$0xf]  ;;  %v3829_v17 = vld [vmem:[#allocation11 + $0x130] sm:$0xf0] }
 0x1cf   : > { %2921 = vmatpush.bf16.msrb.mxu0 %v3764_v15  ;;  %2943 = vmatpush.bf16.msrb.mxu2 %v4404_v16  ;;  %v4949_v14 = vld [vmem:[#allocation11 + $0x46c] sm:$0xf0]  ;;  %v4841_v15 = vld [vmem:[#allocation11 + $0x114] sm:$0xf]  ;;  %v4152_v16 = vor.u32 %v4921_v6, %v4149_v7 }
 0x1d0   : > { %2911 = vmatmul.bf16.vlgmr.msra.gmra.mxu3 %v5699_v10  ;;  %v4531_v18 = vld [vmem:[#allocation11 + $0x690] sm:$0xf]  ;;  %v4244_v22 = vor.u32 %v4949_v14, %v4243_v13  ;;  %v3832_v24 = vor.u32 %v4841_v15, %v3829_v17  ;;  %v4021_v62 = vld [vmem:[#allocation11 + $0x2b0] sm:$0xf0]  ;;  %v4870_v13 = vld [vmem:[#allocation11 + $0x1f4] sm:$0xf0] }
 0x1d1   : > { %2933 = vmatpush.bf16.msrb.mxu1 %v4052_v19  ;;  %2955 = vmatpush.bf16.msrb.mxu3 %v4692_v21  ;;  %v5021_v12 = vld [vmem:[#allocation11 + $0x6ac] sm:$0xf0]  ;;  %v4913_v19 = vld [vmem:[#allocation11 + $0x354] sm:$0xf] }
 0x1d2   : > { %v4117_v21 = vld [vmem:[#allocation11 + $0x370] sm:$0xf0]  ;;  %v4211_v23 = vld [vmem:[#allocation11 + $0x410] sm:$0xf]  ;;  %v4532_v25 = vor.u32 %v5021_v12, %v4531_v18 }
 0x1d3   : > { %2922 = vmatpush.bf16.msrb.mxu0 %v3732_v28  ;;  %2944 = vmatpush.bf16.msrb.mxu2 %v4372_v30  ;;  %v4941_v26 = vld [vmem:[#allocation11 + $0x42c] sm:$0xf0]  ;;  %v3797_v28 = vld [vmem:[#allocation11 + $0xf0] sm:$0xf0]  ;;  %v4120_v29 = vor.u32 %v4913_v19, %v4117_v21 }
 0x1d4   : > { %v4993_v30 = vld [vmem:[#allocation11 + $0x5d4] sm:$0xf]  ;;  %v4499_v32 = vld [vmem:[#allocation11 + $0x650] sm:$0xf]  ;;  %v4212_v36 = vor.u32 %v4941_v26, %v4211_v23  ;;  %v3800_v37 = vor.u32 %v4833_v27, %v3797_v28  ;;  %v4862_v26 = vld [vmem:[#allocation11 + $0x1b4] sm:$0xf0] }
 0x1d5   : > { %2934 = vmatpush.bf16.msrb.mxu1 %v4020_v34  ;;  %2956 = vmatpush.bf16.msrb.mxu3 %v4660_v35  ;;  %v5013_v33 = vld [vmem:[#allocation11 + $0x66c] sm:$0xf0]  ;;  %v4905_v34 = vld [vmem:[#allocation11 + $0x314] sm:$0xf]  ;;  %v4440_v38 = vor.u32 %v4993_v30, %v4437_v31  ;;  %v4187_v31 = vld [vmem:[#allocation11 + $0x3d8] sm:$0xf] }
 0x1d6   : > { %v4085_v35 = vld [vmem:[#allocation11 + $0x330] sm:$0xf0]  ;;  %v4500_v41 = vor.u32 %v5013_v33, %v4499_v32  ;;  %v4467_v45 = vld [vmem:[#allocation11 + $0x610] sm:$0xf]  ;;  %v4934_v32 = vld [vmem:[#allocation11 + $0x3f4] sm:$0xf0] }
 0x1d7   : > { %2923 = vmatpush.bf16.msrb.mxu0 %v3700_v42  ;;  %2945 = vmatpush.bf16.msrb.mxu2 %v4340_v43  ;;  %v4088_v42 = vor.u32 %v4905_v34, %v4085_v35  ;;  %v4985_v43 = vld [vmem:[#allocation11 + $0x594] sm:$0xf]  ;;  %v5005_v46 = vld [vmem:[#allocation11 + $0x62c] sm:$0xf0]  ;;  %v4188_v40 = vor.u32 %v4934_v32, %v4187_v31 }
 0x1d8   : > { %v4468_v55 = vor.u32 %v5005_v46, %v4467_v45  ;;  %v5049_v63 = vld [vmem:[#allocation11 + $0x794] sm:$0xf]  ;;  %v4926_v45 = vld [vmem:[#allocation11 + $0x3b4] sm:$0xf0] }
 0x1d9   : > { %2935 = vmatpush.bf16.msrb.mxu1 %v3988_v47  ;;  %2957 = vmatpush.bf16.msrb.mxu3 %v4628_v48  ;;  %v4897_v47 = vld [vmem:[#allocation11 + $0x2d4] sm:$0xf] }
 0x1da   : > { %2924 = vmatmul.bf16.vlgmr.msrb.gmra.mxu0 %v5687_v5  ;;  %v4053_v48 = vld [vmem:[#allocation11 + $0x2f0] sm:$0xf0] }
 0x1db   : > { %2968 = vmatpush.bf16.msra.mxu0 %v3928_v44  ;;  %2946 = vmatpush.bf16.msrb.mxu2 %v4308_v59  ;;  %v4405_v44 = vld [vmem:[#allocation11 + $0x5b0] sm:$0xf0]  ;;  %v4056_v56 = vor.u32 %v4897_v47, %v4053_v48 }
 0x1dc   : > { %v4408_v54 = vor.u32 %v4985_v43, %v4405_v44  ;;  %v4977_v59 = vld [vmem:[#allocation11 + $0x554] sm:$0xf]  ;;  %v4155_v44 = vld [vmem:[#allocation11 + $0x398] sm:$0xf] }
 0x1dd   : > { %2936 = vmatpush.bf16.msrb.mxu1 %v3956_v49  ;;  %2958 = vmatpush.bf16.msrb.mxu3 %v4596_v61  ;;  %v4373_v49 = vld [vmem:[#allocation11 + $0x570] sm:$0xf0] }
 0x1de   : > { %v4889_v61 = vld [vmem:[#allocation11 + $0x294] sm:$0xf]  ;;  %v4376_v3 = vor.u32 %v4977_v59, %v4373_v49  ;;  %v4123_v59 = vld [vmem:[#allocation11 + $0x358] sm:$0xf] }
 0x1df   : > { %2969 = vmatpush.bf16.msra.mxu0 %v3896_v60  ;;  %2947 = vmatpush.bf16.msrb.mxu2 %v4276_v8  ;;  %v4696_v60 = vor.u32 %v5057_v52, %v4693_v50  ;;  %v4024_v4 = vor.u32 %v4889_v61, %v4021_v62  ;;  %v3701_v6 = vld [vmem:[#allocation11 + $0x30] sm:$0xf0] }
 0x1e0   : > { %2937 = vmatmul.bf16.vlgmr.msrb.gmra.mxu1 %v5690_v20  ;;  %v4969_v7 = vld [vmem:[#allocation11 + $0x514] sm:$0xf]  ;;  %v3704_v18 = vor.u32 %v4809_v2, %v3701_v6  ;;  %v4838_v2 = vld [vmem:[#allocation11 + $0xf4] sm:$0xf0] }
 0x1e1   : > { %2981 = vmatpush.bf16.msra.mxu1 %v4184_v1  ;;  %2959 = vmatpush.bf16.msrb.mxu3 %v4564_v11  ;;  %v3736_v1 = vor.u32 %v4817_v57, %v3733_v58  ;;  %v4341_v8 = vld [vmem:[#allocation11 + $0x530] sm:$0xf0]  ;;  %v3931_v11 = vld [vmem:[#allocation11 + $0x1d8] sm:$0xf] }
 0x1e2   : > { %v4881_v14 = vld [vmem:[#allocation11 + $0x254] sm:$0xf]  ;;  %v4344_v12 = vor.u32 %v4969_v7, %v4341_v8  ;;  %v3932_v19 = vor.u32 %v4870_v13, %v3931_v11  ;;  %v4998_v6 = vld [vmem:[#allocation11 + $0x5f4] sm:$0xf0] }
 0x1e3   : > { %2970 = vmatpush.bf16.msra.mxu0 %v3864_v9  ;;  %2948 = vmatpush.bf16.msrb.mxu2 %v4244_v22  ;;  %v4664_v9 = vor.u32 %v5049_v63, %v4661_v0  ;;  %v3989_v15 = vld [vmem:[#allocation11 + $0x270] sm:$0xf0]  ;;  %v4910_v11 = vld [vmem:[#allocation11 + $0x334] sm:$0xf0] }
 0x1e4   : > { %v4629_v17 = vld [vmem:[#allocation11 + $0x770] sm:$0xf0]  ;;  %v3992_v23 = vor.u32 %v4881_v14, %v3989_v15 }
 0x1e5   : > { %2982 = vmatpush.bf16.msra.mxu1 %v4152_v16  ;;  %2960 = vmatpush.bf16.msrb.mxu3 %v4532_v25  ;;  %v5041_v16 = vld [vmem:[#allocation11 + $0x754] sm:$0xf]  ;;  %v3899_v25 = vld [vmem:[#allocation11 + $0x198] sm:$0xf] }
 0x1e6   : > { %v4961_v21 = vld [vmem:[#allocation11 + $0x4d4] sm:$0xf]  ;;  %v3900_v34 = vor.u32 %v4862_v26, %v3899_v25  ;;  %v4059_v26 = vld [vmem:[#allocation11 + $0x2d8] sm:$0xf] }
 0x1e7   : > { %2971 = vmatpush.bf16.msra.mxu0 %v3832_v24  ;;  %2949 = vmatpush.bf16.msrb.mxu2 %v4212_v36  ;;  %v4309_v22 = vld [vmem:[#allocation11 + $0x4f0] sm:$0xf0]  ;;  %v4632_v24 = vor.u32 %v5041_v16, %v4629_v17  ;;  %v3771_v17 = vld [vmem:[#allocation11 + $0x98] sm:$0xf] }
 0x1e8   : > { %v4873_v27 = vld [vmem:[#allocation11 + $0x214] sm:$0xf]  ;;  %v4312_v33 = vor.u32 %v4961_v21, %v4309_v22  ;;  %v4411_v21 = vld [vmem:[#allocation11 + $0x598] sm:$0xf] }
 0x1e9   : > { %2983 = vmatpush.bf16.msra.mxu1 %v4120_v29  ;;  %2961 = vmatpush.bf16.msrb.mxu3 %v4500_v41  ;;  %v3957_v28 = vld [vmem:[#allocation11 + $0x230] sm:$0xf0]  ;;  %v4854_v41 = vld [vmem:[#allocation11 + $0x174] sm:$0xf0] }
 0x1ea   : > { %2950 = vmatmul.bf16.vlgmr.msrb.gmra.mxu2 %v5695_v51  ;;  %v5033_v29 = vld [vmem:[#allocation11 + $0x714] sm:$0xf]  ;;  %v3960_v35 = vor.u32 %v4873_v27, %v3957_v28  ;;  %v3868_v47 = vor.u32 %v4854_v41, %v3867_v39  ;;  %v4990_v22 = vld [vmem:[#allocation11 + $0x5b4] sm:$0xf0] }
 0x1eb   : > { %2972 = vmatpush.bf16.msra.mxu0 %v3800_v37  ;;  %2994 = vmatpush.bf16.msra.mxu2 %v4440_v38  ;;  %v4597_v30 = vld [vmem:[#allocation11 + $0x730] sm:$0xf0]  ;;  %v4902_v27 = vld [vmem:[#allocation11 + $0x2f4] sm:$0xf0]  ;;  %v4412_v31 = vor.u32 %v4990_v22, %v4411_v21 }
 0x1ec   : > { %v4600_v36 = vor.u32 %v5033_v29, %v4597_v30  ;;  %v4953_v37 = vld [vmem:[#allocation11 + $0x494] sm:$0xf]  ;;  %v4699_v28 = vld [vmem:[#allocation11 + $0x7d8] sm:$0xf] }
 0x1ed   : > { %2984 = vmatpush.bf16.msra.mxu1 %v4088_v42  ;;  %2962 = vmatpush.bf16.msrb.mxu3 %v4468_v55  ;;  %v4277_v38 = vld [vmem:[#allocation11 + $0x4b0] sm:$0xf0]  ;;  %v4846_v55 = vld [vmem:[#allocation11 + $0x134] sm:$0xf0] }
 0x1ee   : > { %v5025_v42 = vld [vmem:[#allocation11 + $0x6d4] sm:$0xf]  ;;  %v4280_v46 = vor.u32 %v4953_v37, %v4277_v38  ;;  %v5062_v29 = vld [vmem:[#allocation11 + $0x7f4] sm:$0xf0] }
 0x1ef   : > { %2973 = vmatpush.bf16.msra.mxu0 %v3768_v53  ;;  %2995 = vmatpush.bf16.msra.mxu2 %v4408_v54  ;;  %v4565_v43 = vld [vmem:[#allocation11 + $0x6f0] sm:$0xf0]  ;;  %v3835_v53 = vld [vmem:[#allocation11 + $0x118] sm:$0xf]  ;;  %v4156_v54 = vor.u32 %v4926_v45, %v4155_v44  ;;  %v4700_v37 = vor.u32 %v5062_v29, %v4699_v28  ;;  %v4850_v28 = vld [vmem:[#allocation11 + $0x15c] sm:$0xf] }
 0x1f0   : > { %2963 = vmatmul.bf16.vlgmr.msrb.gmra.mxu3 %v5699_v10  ;;  %v4568_v48 = vor.u32 %v5025_v42, %v4565_v43  ;;  %v4945_v52 = vld [vmem:[#allocation11 + $0x454] sm:$0xf]  ;;  %v3836_v62 = vor.u32 %v4846_v55, %v3835_v53  ;;  %v4982_v38 = vld [vmem:[#allocation11 + $0x574] sm:$0xf0]  ;;  %v5724_v43 = vld [vmem:[#allocation13] sm:$0xff] }
 0x1f1   : > { %2985 = vmatpush.bf16.msra.mxu1 %v4056_v56  ;;  %3007 = vmatpush.bf16.msra.mxu3 %v4696_v60  ;;  %v4245_v50 = vld [vmem:[#allocation11 + $0x470] sm:$0xf0]  ;;  %v4918_v60 = vld [vmem:[#allocation11 + $0x374] sm:$0xf0] }
 0x1f2   : > { %v5017_v56 = vld [vmem:[#allocation11 + $0x694] sm:$0xf]  ;;  %v4248_v49 = vor.u32 %v4945_v52, %v4245_v50  ;;  %v4027_v39 = vld [vmem:[#allocation11 + $0x298] sm:$0xf] }
 0x1f3   : > { %2974 = vmatpush.bf16.msra.mxu0 %v3736_v1  ;;  %2996 = vmatpush.bf16.msra.mxu2 %v4376_v3  ;;  %v4533_v57 = vld [vmem:[#allocation11 + $0x6b0] sm:$0xf0]  ;;  %v3803_v1 = vld [vmem:[#allocation11 + $0xd8] sm:$0xf]  ;;  %v4124_v3 = vor.u32 %v4918_v60, %v4123_v59 }
 0x1f4   : > { %v4937_v61 = vld [vmem:[#allocation11 + $0x414] sm:$0xf]  ;;  %v4536_v63 = vor.u32 %v5017_v56, %v4533_v57  ;;  %v3804_v15 = vor.u32 %v4838_v2, %v3803_v1  ;;  %v4667_v41 = vld [vmem:[#allocation11 + $0x798] sm:$0xf]  ;;  %v4866_v56 = vld [vmem:[#allocation11 + $0x1dc] sm:$0xf] }
 0x1f5   : > { %2986 = vmatpush.bf16.msra.mxu1 %v4024_v4  ;;  %3008 = vmatpush.bf16.msra.mxu3 %v4664_v9  ;;  %v4213_v0 = vld [vmem:[#allocation11 + $0x430] sm:$0xf0]  ;;  %v4443_v4 = vld [vmem:[#allocation11 + $0x5d8] sm:$0xf]  ;;  %v3933_v57 = vld [vmem:[#allocation11 + $0x1f8] sm:$0xf0] }
 0x1f6   : > { %v5009_v7 = vld [vmem:[#allocation11 + $0x654] sm:$0xf]  ;;  %v4091_v9 = vld [vmem:[#allocation11 + $0x318] sm:$0xf]  ;;  %v4216_v13 = vor.u32 %v4937_v61, %v4213_v0  ;;  %v4444_v16 = vor.u32 %v4998_v6, %v4443_v4  ;;  %v3936_v1 = vor.u32 %v4866_v56, %v3933_v57 }
 0x1f7   : > { %2975 = vmatpush.bf16.msra.mxu0 %v3704_v18  ;;  %2997 = vmatpush.bf16.msra.mxu2 %v4344_v12  ;;  %v5718_v58 = vpop.f32.mrf.mxu0  ;;  %v4501_v8 = vld [vmem:[#allocation11 + $0x670] sm:$0xf0]  ;;  %v4830_v18 = vld [vmem:[#allocation11 + $0xb4] sm:$0xf0] }
 0x1f8   : > { %v4504_v12 = vor.u32 %v5009_v7, %v4501_v8  ;;  %v4469_v25 = vld [vmem:[#allocation11 + $0x630] sm:$0xf0]  ;;  %v3772_v30 = vor.u32 %v4830_v18, %v3771_v17  ;;  %v5054_v42 = vld [vmem:[#allocation11 + $0x7b4] sm:$0xf0]  ;;  %v4858_v7 = vld [vmem:[#allocation11 + $0x19c] sm:$0xf] }
 0x1f9   : > { %2987 = vmatpush.bf16.msra.mxu1 %v3992_v23  ;;  %3009 = vmatpush.bf16.msra.mxu3 %v4632_v24  ;;  %v5001_v23 = vld [vmem:[#allocation11 + $0x614] sm:$0xf]  ;;  %v4814_v52 = vld [vmem:[#allocation11 + $0x34] sm:$0xf0]  ;;  %v4668_v55 = vor.u32 %v5054_v42, %v4667_v41  ;;  %v3901_v8 = vld [vmem:[#allocation11 + $0x1b8] sm:$0xf0] }
 0x1fa   : > { %2976 = vmatmul.bf16.vlgmr.msra.gmra.mxu0 %v5687_v5  ;;  %v4472_v32 = vor.u32 %v5001_v23, %v4469_v25  ;;  %v4347_v50 = vld [vmem:[#allocation11 + $0x518] sm:$0xf]  ;;  %v4930_v18 = vld [vmem:[#allocation11 + $0x3dc] sm:$0xf]  ;;  %v3904_v22 = vor.u32 %v4858_v7, %v3901_v8  ;;  %v1413_v7 = vperm.slane %v5724_v43, 1 }
 0x1fb   : > { %3020 = vmatpush.bf16.msrb.mxu0 %v3932_v19  ;;  %2998 = vmatpush.bf16.msra.mxu2 %v4312_v33  ;;  %v4092_v19 = vor.u32 %v4910_v11, %v4091_v9  ;;  %v4060_v33 = vor.u32 %v4902_v27, %v4059_v26  ;;  %v4974_v53 = vld [vmem:[#allocation11 + $0x534] sm:$0xf0]  ;;  %v4842_v41 = vld [vmem:[#allocation11 + $0x11c] sm:$0xf] }
 0x1fc   : > { %v3995_v59 = vld [vmem:[#allocation11 + $0x258] sm:$0xf]  ;;  %v4348_v0 = vor.u32 %v4974_v53, %v4347_v50  ;;  %v4914_v50 = vld [vmem:[#allocation11 + $0x35c] sm:$0xf] }
 0x1fd   : > { %2988 = vmatpush.bf16.msra.mxu1 %v3960_v35  ;;  %3010 = vmatpush.bf16.msra.mxu3 %v4600_v36  ;;  %v5721_v14 = vpop.f32.mrf.mxu1  ;;  %v4822_v35 = vld [vmem:[#allocation11 + $0x74] sm:$0xf0]  ;;  %v4125_v53 = vld [vmem:[#allocation11 + $0x378] sm:$0xf0] }
 0x1fe   : > { %v4379_v36 = vld [vmem:[#allocation11 + $0x558] sm:$0xf] }
 0x1ff   : > { %3021 = vmatpush.bf16.msrb.mxu0 %v3900_v34  ;;  %2999 = vmatpush.bf16.msra.mxu2 %v4280_v46  ;;  %v2719_v24 = vpop.f32.mrf.mxu0  ;;  %v3739_v34 = vld [vmem:[#allocation11 + $0x58] sm:$0xf] }
 0x200   : > { %2989 = vmatmul.bf16.vlgmr.msra.gmra.mxu1 %v5690_v20  ;;  %v3740_v45 = vor.u32 %v4822_v35, %v3739_v34  ;;  %v3707_v46 = vld [vmem:[#allocation11 + $0x18] sm:$0xf]  ;;  %v4157_v34 = vld [vmem:[#allocation11 + $0x3b8] sm:$0xf0] }
 0x201   : > { %3033 = vmatpush.bf16.msrb.mxu1 %v4188_v40  ;;  %3011 = vmatpush.bf16.msra.mxu3 %v4568_v48  ;;  %v4894_v40 = vld [vmem:[#allocation11 + $0x2b4] sm:$0xf0] }
 0x202   : > { %v4028_v48 = vor.u32 %v4894_v40, %v4027_v39  ;;  %v4886_v60 = vld [vmem:[#allocation11 + $0x274] sm:$0xf0] }
 0x203   : > { %3022 = vmatpush.bf16.msrb.mxu0 %v3868_v47  ;;  %3000 = vmatpush.bf16.msra.mxu2 %v4248_v49  ;;  %v4380_v47 = vor.u32 %v4982_v38, %v4379_v36  ;;  %v4635_v49 = vld [vmem:[#allocation11 + $0x758] sm:$0xf]  ;;  %v3996_v4 = vor.u32 %v4886_v60, %v3995_v59 }
 0x204   : > { %v5046_v61 = vld [vmem:[#allocation11 + $0x774] sm:$0xf0] }
 0x205   : > { %3034 = vmatpush.bf16.msrb.mxu1 %v4156_v54  ;;  %3012 = vmatpush.bf16.msra.mxu3 %v4536_v63  ;;  %v2732_v44 = vpop.f32.mrf.mxu1  ;;  %v1412_v63 = vperm.slane %v5724_v43, 0  ;;  %v4315_v2 = vld [vmem:[#allocation11 + $0x4d8] sm:$0xf]  ;;  %v4636_v6 = vor.u32 %v5046_v61, %v4635_v49  ;;  %v4834_v61 = vld [vmem:[#allocation11 + $0xdc] sm:$0xf] }
 0x206   : > { %v3963_v9 = vld [vmem:[#allocation11 + $0x218] sm:$0xf] }
 0x207   : > { %3023 = vmatpush.bf16.msrb.mxu0 %v3836_v62  ;;  %3001 = vmatpush.bf16.msra.mxu2 %v4216_v13  ;;  %v5726_v54 = vpop.f32.mrf.mxu0  ;;  %v3708_v62 = vor.u32 %v4814_v52, %v3707_v46  ;;  %v4878_v11 = vld [vmem:[#allocation11 + $0x234] sm:$0xf0] }
 0x208   : > { %v4603_v13 = vld [vmem:[#allocation11 + $0x718] sm:$0xf]  ;;  %v3964_v24 = vor.u32 %v4878_v11, %v3963_v9 }
 0x209   : > { %3035 = vmatpush.bf16.msrb.mxu1 %v4124_v3  ;;  %3013 = vmatpush.bf16.msra.mxu3 %v4504_v12  ;;  %v4966_v3 = vld [vmem:[#allocation11 + $0x4f4] sm:$0xf0]  ;;  %v4189_v12 = vld [vmem:[#allocation11 + $0x3f8] sm:$0xf0] }
 0x20a   : > { %3002 = vmatmul.bf16.vlgmr.msra.gmra.mxu2 %v5695_v51  ;;  %v4316_v21 = vor.u32 %v4966_v3, %v4315_v2  ;;  %v4283_v26 = vld [vmem:[#allocation11 + $0x498] sm:$0xf] }
 0x20b   : > { %3024 = vmatpush.bf16.msrb.mxu0 %v3804_v15  ;;  %3046 = vmatpush.bf16.msrb.mxu2 %v4444_v16  ;;  %v5038_v15 = vld [vmem:[#allocation11 + $0x734] sm:$0xf0] }
 0x20c   : > { %v4604_v25 = vor.u32 %v5038_v15, %v4603_v13  ;;  %v4958_v27 = vld [vmem:[#allocation11 + $0x4b4] sm:$0xf0]  ;;  %v4826_v15 = vld [vmem:[#allocation11 + $0x9c] sm:$0xf] }
 0x20d   : > { %3036 = vmatpush.bf16.msrb.mxu1 %v4092_v19  ;;  %3014 = vmatpush.bf16.msra.mxu3 %v4472_v32  ;;  %v2743_v16 = vpop.f32.mrf.mxu2  ;;  %v5730_v17 = vpop.f32.mrf.mxu1  ;;  %v2718_v19 = vadd.f32 %v5718_v58, %v1412_v63  ;;  %v4571_v58 = vld [vmem:[#allocation11 + $0x6d8] sm:$0xf]  ;;  %v4284_v36 = vor.u32 %v4958_v27, %v4283_v26  ;;  %v4128_v63 = vor.u32 %v4914_v50, %v4125_v53  ;;  %v4061_v26 = vld [vmem:[#allocation11 + $0x2f8] sm:$0xf0] }
 0x20e   : > { %v5030_v32 = vld [vmem:[#allocation11 + $0x6f4] sm:$0xf0]  ;;  %v2770_v27 = vadd.f32 %v5726_v54, %v1413_v7  ;;  %v3709_v50 = vld [vmem:[#allocation11 + $0x38] sm:$0xf0] }
 0x20f   : > { %3025 = vmatpush.bf16.msrb.mxu0 %v3772_v30  ;;  %3047 = vmatpush.bf16.msrb.mxu2 %v4412_v31  ;;  %v2771_v23 = vpop.f32.mrf.mxu0  ;;  %v2731_v29 = vadd.f32 %v5721_v14, %v2718_v19  ;;  %v4192_v30 = vor.u32 %v4930_v18, %v4189_v12  ;;  %v3869_v31 = vld [vmem:[#allocation11 + $0x178] sm:$0xf0]  ;;  %v4572_v39 = vor.u32 %v5030_v32, %v4571_v58  ;;  %v4251_v40 = vld [vmem:[#allocation11 + $0x458] sm:$0xf] }
 0x210   : > { %3015 = vmatmul.bf16.vlgmr.msra.gmra.mxu3 %v5699_v10  ;;  %v3872_v38 = vor.u32 %v4850_v28, %v3869_v31  ;;  %v4950_v14 = vld [vmem:[#allocation11 + $0x474] sm:$0xf0]  ;;  %v4986_v19 = vld [vmem:[#allocation11 + $0x59c] sm:$0xf] }
 0x211   : > { %3037 = vmatpush.bf16.msrb.mxu1 %v4060_v33  ;;  %3059 = vmatpush.bf16.msrb.mxu3 %v4700_v37  ;;  %v4922_v33 = vld [vmem:[#allocation11 + $0x39c] sm:$0xf]  ;;  %v2744_v35 = vadd.f32 %v2743_v16, %v2731_v29  ;;  %v4539_v46 = vld [vmem:[#allocation11 + $0x698] sm:$0xf] }
 0x212   : > { %v4160_v44 = vor.u32 %v4922_v33, %v4157_v34  ;;  %v4219_v56 = vld [vmem:[#allocation11 + $0x418] sm:$0xf]  ;;  %v3773_v16 = vld [vmem:[#allocation11 + $0xb8] sm:$0xf0]  ;;  %v2783_v33 = vadd.f32 %v5730_v17, %v2770_v27 }
 0x213   : > { %3026 = vmatpush.bf16.msrb.mxu0 %v3740_v45  ;;  %3048 = vmatpush.bf16.msrb.mxu2 %v4380_v47  ;;  %v2756_v37 = vpop.f32.mrf.mxu3  ;;  %v3837_v45 = vld [vmem:[#allocation11 + $0x138] sm:$0xf0]  ;;  %v5022_v47 = vld [vmem:[#allocation11 + $0x6b4] sm:$0xf0]  ;;  %v3776_v58 = vor.u32 %v4826_v15, %v3773_v16 }
 0x214   : > { %v2757_v42 = vadd.f32 %v2756_v37, %v2744_v35  ;;  %v3840_v59 = vor.u32 %v4842_v41, %v3837_v45  ;;  %v4540_v60 = vor.u32 %v5022_v47, %v4539_v46  ;;  %v4942_v49 = vld [vmem:[#allocation11 + $0x434] sm:$0xf0]  ;;  %v5058_v29 = vld [vmem:[#allocation11 + $0x7dc] sm:$0xf] }
 0x215   : > { %3038 = vmatpush.bf16.msrb.mxu1 %v4028_v48  ;;  %3060 = vmatpush.bf16.msrb.mxu3 %v4668_v55  ;;  %v2745_v48 = vpop.f32.mrf.mxu2  ;;  %v2784_v52 = vpop.f32.mrf.mxu1  ;;  %v4252_v55 = vor.u32 %v4950_v14, %v4251_v40  ;;  %v4507_v2 = vld [vmem:[#allocation11 + $0x658] sm:$0xf]  ;;  %v4220_v8 = vor.u32 %v4942_v49, %v4219_v56  ;;  %v3741_v37 = vld [vmem:[#allocation11 + $0x78] sm:$0xf0] }
 0x216   : > { %3124 = vst [vmem:[%s5738_s2] sm:$0xff] %v2757_v42  ;;  %v5014_v3 = vld [vmem:[#allocation11 + $0x674] sm:$0xf0]  ;;  %v4890_v40 = vld [vmem:[#allocation11 + $0x29c] sm:$0xf] }
 0x217   : > { %3027 = vmatpush.bf16.msrb.mxu0 %v3708_v62  ;;  %3049 = vmatpush.bf16.msrb.mxu2 %v4348_v0  ;;  %v5742_v57 = vpop.f32.mrf.mxu0  ;;  %v3805_v62 = vld [vmem:[#allocation11 + $0xf8] sm:$0xf0]  ;;  %v4508_v18 = vor.u32 %v5014_v3, %v4507_v2 }
 0x218   : > { %v4994_v0 = vld [vmem:[#allocation11 + $0x5dc] sm:$0xf]  ;;  %v3808_v11 = vor.u32 %v4834_v61, %v3805_v62 }
 0x219   : > { %3039 = vmatpush.bf16.msrb.mxu1 %v3996_v4  ;;  %3061 = vmatpush.bf16.msrb.mxu3 %v4636_v6  ;;  %v4906_v4 = vld [vmem:[#allocation11 + $0x31c] sm:$0xf] }
 0x21a   : > { %3028 = vmatmul.bf16.vlgmr.msrb.gmra.mxu0 %v5687_v5  ;;  %v4093_v6 = vld [vmem:[#allocation11 + $0x338] sm:$0xf0] }
 0x21b   : > { %3072 = vmatpush.bf16.msra.mxu0 %v3936_v1  ;;  %3050 = vmatpush.bf16.msrb.mxu2 %v4316_v21  ;;  %v4445_v1 = vld [vmem:[#allocation11 + $0x5f8] sm:$0xf0]  ;;  %v2758_v9 = vpop.f32.mrf.mxu3  ;;  %v4096_v12 = vor.u32 %v4906_v4, %v4093_v6 }
 0x21c   : > { %v4448_v13 = vor.u32 %v4994_v0, %v4445_v1  ;;  %v4413_v21 = vld [vmem:[#allocation11 + $0x5b8] sm:$0xf0] }
 0x21d   : > { %3040 = vmatpush.bf16.msrb.mxu1 %v3964_v24  ;;  %3062 = vmatpush.bf16.msrb.mxu3 %v4604_v25  ;;  %v2795_v23 = vpop.f32.mrf.mxu2  ;;  %v5006_v24 = vld [vmem:[#allocation11 + $0x634] sm:$0xf0]  ;;  %v4898_v25 = vld [vmem:[#allocation11 + $0x2dc] sm:$0xf]  ;;  %v5746_v28 = vpop.f32.mrf.mxu1  ;;  %v4416_v32 = vor.u32 %v4986_v19, %v4413_v21 }
 0x21e   : > { %v4064_v35 = vor.u32 %v4898_v25, %v4061_v26  ;;  %v4029_v14 = vld [vmem:[#allocation11 + $0x2b8] sm:$0xf0]  ;;  %v2796_v41 = vadd.f32 %v2795_v23, %v2783_v33 }
 0x21f   : > { %3073 = vmatpush.bf16.msra.mxu0 %v3904_v22  ;;  %3051 = vmatpush.bf16.msrb.mxu2 %v4284_v36  ;;  %v4475_v22 = vld [vmem:[#allocation11 + $0x618] sm:$0xf]  ;;  %v2823_v31 = vpop.f32.mrf.mxu0  ;;  %v4818_v36 = vld [vmem:[#allocation11 + $0x5c] sm:$0xf]  ;;  %v4032_v48 = vor.u32 %v4890_v40, %v4029_v14 }
 0x220   : > { %3041 = vmatmul.bf16.vlgmr.msrb.gmra.mxu1 %v5690_v20  ;;  %v4476_v34 = vor.u32 %v5006_v24, %v4475_v22  ;;  %v5050_v42 = vld [vmem:[#allocation11 + $0x79c] sm:$0xf]  ;;  %v3744_v17 = vor.u32 %v4818_v36, %v3741_v37 }
 0x221   : > { %3085 = vmatpush.bf16.msra.mxu1 %v4192_v30  ;;  %3063 = vmatpush.bf16.msrb.mxu3 %v4572_v39  ;;  %v4701_v30 = vld [vmem:[#allocation11 + $0x7f8] sm:$0xf0] }
 0x222   : > { %v4704_v54 = vor.u32 %v5058_v29, %v4701_v30  ;;  %v4381_v39 = vld [vmem:[#allocation11 + $0x578] sm:$0xf0] }
 0x223   : > { %3074 = vmatpush.bf16.msra.mxu0 %v3872_v38  ;;  %3052 = vmatpush.bf16.msrb.mxu2 %v4252_v55  ;;  %v4978_v38 = vld [vmem:[#allocation11 + $0x55c] sm:$0xf]  ;;  %v2808_v45 = vpop.f32.mrf.mxu3 }
 0x224   : > { %v2809_v46 = vadd.f32 %v2808_v45, %v2796_v41  ;;  %v4384_v47 = vor.u32 %v4978_v38, %v4381_v39  ;;  %v4810_v52 = vld [vmem:[#allocation11 + $0x1c] sm:$0xf] }
 0x225   : > { %3086 = vmatpush.bf16.msra.mxu1 %v4160_v44  ;;  %3064 = vmatpush.bf16.msrb.mxu3 %v4540_v60  ;;  %v4669_v44 = vld [vmem:[#allocation11 + $0x7b8] sm:$0xf0]  ;;  %v2797_v55 = vpop.f32.mrf.mxu2  ;;  %v2836_v61 = vpop.f32.mrf.mxu1  ;;  %v3712_v0 = vor.u32 %v4810_v52, %v3709_v50 }
 0x226   : > { %v4970_v53 = vld [vmem:[#allocation11 + $0x51c] sm:$0xf]  ;;  %v4672_v56 = vor.u32 %v5050_v42, %v4669_v44  ;;  %3125 = vst [vmem:[%s5738_s2 + $0x8] sm:$0xff] %v2809_v46 }
 0x227   : > { %3075 = vmatpush.bf16.msra.mxu0 %v3840_v59  ;;  %3053 = vmatpush.bf16.msrb.mxu2 %v4220_v8  ;;  %v4349_v59 = vld [vmem:[#allocation11 + $0x538] sm:$0xf0] }
 0x228   : > { %v4882_v60 = vld [vmem:[#allocation11 + $0x25c] sm:$0xf]  ;;  %v4352_v1 = vor.u32 %v4970_v53, %v4349_v59 }
 0x229   : > { %3087 = vmatpush.bf16.msra.mxu1 %v4128_v63  ;;  %3065 = vmatpush.bf16.msrb.mxu3 %v4508_v18  ;;  %v3997_v49 = vld [vmem:[#allocation11 + $0x278] sm:$0xf0] }
 0x22a   : > { %3054 = vmatmul.bf16.vlgmr.msrb.gmra.mxu2 %v5695_v51  ;;  %v5042_v62 = vld [vmem:[#allocation11 + $0x75c] sm:$0xf]  ;;  %v4000_v2 = vor.u32 %v4882_v60, %v3997_v49 }
 0x22b   : > { %3076 = vmatpush.bf16.msra.mxu0 %v3808_v11  ;;  %3098 = vmatpush.bf16.msra.mxu2 %v4448_v13  ;;  %v4637_v63 = vld [vmem:[#allocation11 + $0x778] sm:$0xf0]  ;;  %v1414_v13 = vperm.slane %v5724_v43, 2  ;;  %v2810_v15 = vpop.f32.mrf.mxu3 }
 0x22c   : > { %v4962_v3 = vld [vmem:[#allocation11 + $0x4dc] sm:$0xf]  ;;  %v4640_v4 = vor.u32 %v5042_v62, %v4637_v63  ;;  %v1416_v63 = vperm.slane %v5724_v43, 4  ;;  %v1417_v15 = vperm.slane %v5724_v43, 5 }
 0x22d   : > { %3088 = vmatpush.bf16.msra.mxu1 %v4096_v12  ;;  %3066 = vmatpush.bf16.msrb.mxu3 %v4476_v34  ;;  %v4317_v6 = vld [vmem:[#allocation11 + $0x4f8] sm:$0xf0]  ;;  %v2847_v12 = vpop.f32.mrf.mxu2  ;;  %v2822_v25 = vadd.f32 %v5742_v57, %v1414_v13 }
 0x22e   : > { %v4874_v7 = vld [vmem:[#allocation11 + $0x21c] sm:$0xf]  ;;  %v4320_v16 = vor.u32 %v4962_v3, %v4317_v6 }
 0x22f   : > { %3077 = vmatpush.bf16.msra.mxu0 %v3776_v58  ;;  %3099 = vmatpush.bf16.msra.mxu2 %v4416_v32  ;;  %v3965_v8 = vld [vmem:[#allocation11 + $0x238] sm:$0xf0]  ;;  %v2835_v27 = vadd.f32 %v5746_v28, %v2822_v25 }
 0x230   : > { %3067 = vmatmul.bf16.vlgmr.msrb.gmra.mxu3 %v5699_v10  ;;  %v5034_v9 = vld [vmem:[#allocation11 + $0x71c] sm:$0xf]  ;;  %v3968_v18 = vor.u32 %v4874_v7, %v3965_v8 }
 0x231   : > { %3089 = vmatpush.bf16.msra.mxu1 %v4064_v35  ;;  %3111 = vmatpush.bf16.msra.mxu3 %v4704_v54  ;;  %v4605_v11 = vld [vmem:[#allocation11 + $0x738] sm:$0xf0]  ;;  %v2848_v33 = vadd.f32 %v2847_v12, %v2835_v27 }
 0x232   : > { %v4608_v19 = vor.u32 %v5034_v9, %v4605_v11  ;;  %v4954_v21 = vld [vmem:[#allocation11 + $0x49c] sm:$0xf] }
 0x233   : > { %3078 = vmatpush.bf16.msra.mxu0 %v3744_v17  ;;  %3100 = vmatpush.bf16.msra.mxu2 %v4384_v47  ;;  %v4285_v22 = vld [vmem:[#allocation11 + $0x4b8] sm:$0xf0]  ;;  %v1415_v47 = vperm.slane %v5724_v43, 3 }
 0x234   : > { %v5026_v23 = vld [vmem:[#allocation11 + $0x6dc] sm:$0xf]  ;;  %v4288_v26 = vor.u32 %v4954_v21, %v4285_v22 }
 0x235   : > { %3090 = vmatpush.bf16.msra.mxu1 %v4032_v48  ;;  %3112 = vmatpush.bf16.msra.mxu3 %v4672_v56  ;;  %v4573_v24 = vld [vmem:[#allocation11 + $0x6f8] sm:$0xf0]  ;;  %v2849_v36 = vpop.f32.mrf.mxu2 }
 0x236   : > { %v4576_v29 = vor.u32 %v5026_v23, %v4573_v24  ;;  %v4946_v30 = vld [vmem:[#allocation11 + $0x45c] sm:$0xf] }
 0x237   : > { %3079 = vmatpush.bf16.msra.mxu0 %v3712_v0  ;;  %3101 = vmatpush.bf16.msra.mxu2 %v4352_v1  ;;  %v4253_v31 = vld [vmem:[#allocation11 + $0x478] sm:$0xf0]  ;;  %v2873_v34 = vpop.f32.mrf.mxu0 }
 0x238   : > { %v5018_v58 = vld [vmem:[#allocation11 + $0x69c] sm:$0xf]  ;;  %v4256_v35 = vor.u32 %v4946_v30, %v4253_v31  ;;  %v2874_v52 = vadd.f32 %v2873_v34, %v1415_v47  ;;  %v1418_v30 = vperm.slane %v5724_v43, 6 }
 0x239   : > { %3091 = vmatpush.bf16.msra.mxu1 %v4000_v2  ;;  %3113 = vmatpush.bf16.msra.mxu3 %v4640_v4  ;;  %v4541_v32 = vld [vmem:[#allocation11 + $0x6b8] sm:$0xf0] }
 0x23a   : > { %3080 = vmatmul.bf16.vlgmr.msra.gmra.mxu0 %v5687_v5  ;;  %v2860_v5 = vpop.f32.mrf.mxu3  ;;  %v4544_v37 = vor.u32 %v5018_v58, %v4541_v32  ;;  %v4938_v38 = vld [vmem:[#allocation11 + $0x41c] sm:$0xf] }
 0x23b   : > { %3102 = vmatpush.bf16.msra.mxu2 %v4320_v16  ;;  %v2861_v57 = vadd.f32 %v2860_v5, %v2848_v33  ;;  %v4221_v28 = vld [vmem:[#allocation11 + $0x438] sm:$0xf0] }
 0x23c   : > { %v5010_v54 = vld [vmem:[#allocation11 + $0x65c] sm:$0xf]  ;;  %v4224_v40 = vor.u32 %v4938_v38, %v4221_v28 }
 0x23d   : > { %3092 = vmatpush.bf16.msra.mxu1 %v3968_v18  ;;  %3114 = vmatpush.bf16.msra.mxu3 %v4608_v19  ;;  %v4509_v39 = vld [vmem:[#allocation11 + $0x678] sm:$0xf0]  ;;  %3126 = vst [vmem:[%s5738_s2 + $0x10] sm:$0xff] %v2861_v57  ;;  %v2886_v41 = vpop.f32.mrf.mxu1 }
 0x23e   : > { %v4512_v14 = vor.u32 %v5010_v54, %v4509_v39  ;;  %v5002_v42 = vld [vmem:[#allocation11 + $0x61c] sm:$0xf]  ;;  %v2887_v50 = vadd.f32 %v2886_v41, %v2874_v52  ;;  %v1419_v54 = vperm.slane %v5724_v43, 7 }
 0x23f   : > { %3103 = vmatpush.bf16.msra.mxu2 %v4288_v26  ;;  %v2875_v45 = vpop.f32.mrf.mxu0 }
 0x240   : > { %3093 = vmatmul.bf16.vlgmr.msra.gmra.mxu1 %v5690_v20  ;;  %v4477_v20 = vld [vmem:[#allocation11 + $0x638] sm:$0xf0] }
 0x241   : > { %3115 = vmatpush.bf16.msra.mxu3 %v4576_v29  ;;  %v4480_v17 = vor.u32 %v5002_v42, %v4477_v20 }
 0x242   : > { %v2862_v44 = vpop.f32.mrf.mxu3 }
 0x243   : > { %3104 = vmatpush.bf16.msra.mxu2 %v4256_v35 }
 0x245   : > { %3116 = vmatpush.bf16.msra.mxu3 %v4544_v37  ;;  %v2888_v46 = vpop.f32.mrf.mxu1 }
 0x247   : > { %3105 = vmatpush.bf16.msra.mxu2 %v4224_v40 }
 0x249   : > { %3117 = vmatpush.bf16.msra.mxu3 %v4512_v14 }
 0x24a   : > { %3106 = vmatmul.bf16.vlgmr.msra.gmra.mxu2 %v5695_v51 }
 0x24d   : > { %3118 = vmatpush.bf16.msra.mxu3 %v4480_v17  ;;  %v2899_v48 = vpop.f32.mrf.mxu2 }
 0x24e   : > { %v2900_v53 = vadd.f32 %v2899_v48, %v2887_v50 }
 0x250   : > { %3119 = vmatmul.bf16.vlgmr.msra.gmra.mxu3 %v5699_v10 }
 0x253   : > { %v2912_v55 = vpop.f32.mrf.mxu3 }
 0x254   : > { %v2913_v56 = vadd.f32 %v2912_v55, %v2900_v53 }
 0x255   : > { %v2901_v60 = vpop.f32.mrf.mxu2 }
 0x256   : > { %3127 = vst [vmem:[%s5738_s2 + $0x18] sm:$0xff] %v2913_v56 }
 0x257   : > { %v2925_v59 = vpop.f32.mrf.mxu0 }
 0x258   : > { %v2926_v10 = vadd.f32 %v2925_v59, %v1416_v63 }
 0x25b   : > { %v2914_v61 = vpop.f32.mrf.mxu3 }
 0x25d   : > { %v2938_v49 = vpop.f32.mrf.mxu1 }
 0x25e   : > { %v2939_v1 = vadd.f32 %v2938_v49, %v2926_v10 }
 0x25f   : > { %v2927_v62 = vpop.f32.mrf.mxu0 }
 0x265   : > { %v2940_v51 = vpop.f32.mrf.mxu1 }
 0x26d   : > { %v2951_v0 = vpop.f32.mrf.mxu2 }
 0x26e   : > { %v2952_v2 = vadd.f32 %v2951_v0, %v2939_v1 }
 0x273   : > { %v2964_v3 = vpop.f32.mrf.mxu3 }
 0x274   : > { %v2965_v4 = vadd.f32 %v2964_v3, %v2952_v2 }
 0x275   : > { %v2953_v7 = vpop.f32.mrf.mxu2 }
 0x276   : > { %3128 = vst [vmem:[%s5738_s2 + $0x20] sm:$0xff] %v2965_v4 }
 0x277   : > { %v2977_v6 = vpop.f32.mrf.mxu0 }
 0x278   : > { %v2978_v18 = vadd.f32 %v2977_v6, %v1417_v15 }
 0x27b   : > { %v2966_v9 = vpop.f32.mrf.mxu3 }
 0x27d   : > { %v2990_v8 = vpop.f32.mrf.mxu1 }
 0x27e   : > { %v2991_v12 = vadd.f32 %v2990_v8, %v2978_v18 }
 0x27f   : > { %v2979_v11 = vpop.f32.mrf.mxu0 }
 0x285   : > { %v2992_v13 = vpop.f32.mrf.mxu1 }
 0x28d   : > { %v3003_v16 = vpop.f32.mrf.mxu2 }
 0x28e   : > { %v3004_v19 = vadd.f32 %v3003_v16, %v2991_v12 }
 0x293   : > { %v3016_v21 = vpop.f32.mrf.mxu3 }
 0x294   : > { %v3017_v22 = vadd.f32 %v3016_v21, %v3004_v19 }
 0x295   : > { %v3005_v24 = vpop.f32.mrf.mxu2 }
 0x296   : > { %3129 = vst [vmem:[%s5738_s2 + $0x28] sm:$0xff] %v3017_v22 }
 0x297   : > { %v3029_v23 = vpop.f32.mrf.mxu0 }
 0x298   : > { %v3030_v58 = vadd.f32 %v3029_v23, %v1418_v30 }
 0x29b   : > { %v3018_v26 = vpop.f32.mrf.mxu3 }
 0x29d   : > { %v3042_v25 = vpop.f32.mrf.mxu1 }
 0x29e   : > { %v3043_v32 = vadd.f32 %v3042_v25, %v3030_v58 }
 0x29f   : > { %v3031_v27 = vpop.f32.mrf.mxu0 }
 0x2a5   : > { %v3044_v29 = vpop.f32.mrf.mxu1 }
 0x2ad   : > { %v3055_v31 = vpop.f32.mrf.mxu2 }
 0x2ae   : > { %v3056_v33 = vadd.f32 %v3055_v31, %v3043_v32 }
 0x2b3   : > { %v3068_v5 = vpop.f32.mrf.mxu3 }
 0x2b4   : > { %v3069_v34 = vadd.f32 %v3068_v5, %v3056_v33 }
 0x2b5   : > { %v3057_v57 = vpop.f32.mrf.mxu2 }
 0x2b6   : > { %3130 = vst [vmem:[%s5738_s2 + $0x30] sm:$0xff] %v3069_v34 }
 0x2b7   : > { %v3081_v35 = vpop.f32.mrf.mxu0 }
 0x2b8   : > { %v3082_v39 = vadd.f32 %v3081_v35, %v1419_v54 }
 0x2bb   : > { %v3070_v37 = vpop.f32.mrf.mxu3 }
 0x2bd   : > { %v3094_v36 = vpop.f32.mrf.mxu1 }
 0x2be   : > { %v3095_v14 = vadd.f32 %v3094_v36, %v3082_v39 }
 0x2bf   : > { %v3083_v38 = vpop.f32.mrf.mxu0 }
 0x2c5   : > { %v3096_v28 = vpop.f32.mrf.mxu1 }
 0x2cd   : > { %v3107_v40 = vpop.f32.mrf.mxu2 }
 0x2ce   : > { %v3108_v41 = vadd.f32 %v3107_v40, %v3095_v14 }
 0x2d3   : > { %v3120_v42 = vpop.f32.mrf.mxu3 }
 0x2d4   : > { %v3121_v20 = vadd.f32 %v3120_v42, %v3108_v41 }
 0x2d5   : > { %v3109_v44 = vpop.f32.mrf.mxu2 }
 0x2d6   : > { %3131 = vst [vmem:[%s5738_s2 + $0x38] sm:$0xff] %v3121_v20 }
 0x2d7   : > { %5414 = shalt.err (!%p5411_p9)
}
 0x2d8   : > { %5090 = dma.vmem_to_hbm [thread:$0]  (%p5616_p4), %s3147_s13, 1024, %s3149_s11, %s3133_s22  }
 0x2db   : > { %v3122_v43 = vpop.f32.mrf.mxu3 }
 0x2dc PF: > { %s3160_s18 = sand.u32 1, %s5453_s24   ;;  %p5823_p10 = scmp.ge.s32.totalorder %s5465_s27, 2 }
 0x2dd   : > { %s3161_s1 = scalar_lea.sflag [#allocation4], %s3160_s18 }
 0x2de   : > { %p5116_p13 = pnand %p5823_p10, %p5620_p6 }
 0x2e0   : > { %p5117_p11 = pneg %p5116_p13 }
 0x2e2   : > { %5448 = dma.done.wait (%p5117_p11), %s3161_s1, 1024  }
 0x2e3   : > { %5450 = vsyncadd (%p5117_p11), %s3161_s1, 4294966272  ;;  %p23_p0 = scmp.ge.s32.totalorder %s5590_s16, 4   ;;  %s5824_s24 = smov %s5457_s25 }
 0x2e4   : > { %s5825_s25 = smov %s5461_s26  ;;  %s5826_s26 = smov %s5601_s14 }
 0x2e5   : > { %s5827_s27 = smov %s5590_s16  ;;  %25 = sbr.rel (!%p23_p0) target bundleno = 11 (0xb), region = 117 }
 0x2ea   :  { %3167 = vsyncpa [#allocation3], 1 }
 0x2eb   :  { %3169 = vsyncpa [#allocation3 + $0x1], 1 }
 0x2ec   :  { %3170 = vsyncpa [#allocation6], 1 }
 0x2ed   :  { %3171 = vsyncpa [#allocation9], 1 }
 0x2ee   :  { %3172 = vsyncpa [#allocation12], 1 }
 0x2ef   :  { %3173 = vsyncpa [#allocation4], 1 }
 0x2f0   :  { %3175 = vsyncpa [#allocation4 + $0x1], 1 }

</bundles_post_ra>
